<compile_context>
chip_gen: v7x
topology: tpu7x:2x2x1
jax: 0.10.0
libtpu: 0.0.40
codegen_flags: <defaults>
</compile_context>

<pallas_src>
import jax
import jax.numpy as jnp
from jax.experimental import pallas as pl
from jax.experimental.pallas import tpu as pltpu


# ----------------------------- GPTQ pack / dequant (host glue) -------------------------

def pack_int4(q):
    """Pack int4 values (E, K, N) -> int32 qweight (E, K//8, N), GPTQ-style along K."""
    E, K, N = q.shape
    q = q.reshape(E, K // 8, 8, N).astype(jnp.uint32)
    packed = q[:, :, 0, :]
    for j in range(1, 8):
        packed = packed | (q[:, :, j, :] << (4 * j))
    return jax.lax.bitcast_convert_type(packed, jnp.int32)


def dequant_gptq_sym_bf16(qweight, scales):
    """Host reference dequant: packed int32 + f32 scales -> bf16 weights (per-element
    math matches the in-kernel dequant exactly)."""
    E, Kp, N = qweight.shape
    shifts = (jnp.arange(8, dtype=jnp.int32) * 4).reshape(1, 1, 8, 1)
    q = (qweight[:, :, None, :] >> shifts) & 0xF
    q = q.reshape(E, Kp * 8, N)
    return ((q - 8).astype(jnp.float32) * scales).astype(jnp.bfloat16)


# ----------------------------- routing (softmax top-k, host glue) ----------------------

def topk_softmax_routing(gating_output, topk, renormalize):
    """scoring_func='softmax' top-k routing -> dense (T, E) routing-weight matrix."""
    T, E = gating_output.shape
    probs = jax.nn.softmax(gating_output.astype(jnp.float32), axis=-1)
    vals, idx = jax.lax.top_k(probs, topk)
    if renormalize:
        vals = vals / jnp.sum(vals, axis=-1, keepdims=True)
    dense = jnp.zeros((T, E), jnp.float32)
    dense = dense.at[jnp.arange(T)[:, None], idx].add(vals)
    return dense


# ----------------------------- tiling / layout helpers ---------------------------------

def _device_kind():
    try:
        return jax.devices()[0].device_kind.lower()
    except Exception:
        return ""


def _pick_tn(N, kind):
    # v7x: 64 MiB VMEM -> keep N tiles <= 256; v5e/v6e: bigger tiles (fewer grid steps,
    # larger DMAs, full MXU width on v6e).
    cap = 256 if "v7" in kind else 512
    for cand in (512, 256, 128):
        if cand <= cap and N % cand == 0:
            return cand
    return N


def _pick_tt(T, kind):
    # Big token tiles amortize dequant / weight streaming (they scale with T // TT).
    cap = 256 if "v7" in kind else 512
    tt = T
    for cand in (512, 256, 128, 64, 32, 16):   # multiples of 16: bf16-friendly sublanes
        if cand <= cap and T % cand == 0:
            tt = cand
            break
    # v7x has 2 TensorCores: make the parallel token axis have >= 2 tiles if possible.
    if "v7" in kind and T // tt < 2 and tt % 32 == 0:
        tt //= 2
    return tt


def _nibble_col_perm(N, TN):
    """Per-TN-tile column permutation: kernel position j*(TN//8)+s <- original 8*s+j,
    so act's column blocks line up with the down-proj nibble packing."""
    nt8 = TN // 8
    idx = jnp.arange(N, dtype=jnp.int32).reshape(N // TN, nt8, 8)
    return idx.transpose(0, 2, 1).reshape(N)


# ----------------------------- Pallas MoE kernel ---------------------------------------

def _moe_kernel(eids_ref, neff_ref, aflag_ref,      # SMEM scalar prefetch
                xp_ref,                             # (TT, K)   bf16 (nibble-permuted K)
                gq_ref, gs_ref,                     # (1, K//8, TN) int32 / (1, 1, TN) f32
                uq_ref, us_ref,                     # (1, K//8, TN) int32 / (1, 1, TN) f32
                dq_ref, ds_ref,                     # (1, TN//8, K) int32 / (1, 1, K)  f32
                route_ref,                          # (1, TT, 1) f32
                o_ref,                              # (TT, K) out
                acc_ref):                           # (TT, K) f32 VMEM scratch (routed sum)
    e = pl.program_id(1)
    n = pl.program_id(2)
    last_e = pl.num_programs(1) - 1
    last_n = pl.num_programs(2) - 1

    @pl.when((e == 0) & (n == 0))
    def _():
        acc_ref[...] = jnp.zeros_like(acc_ref)

    # Skip compute for expert slots past num_active (their weight DMAs are also skipped
    # because the index maps freeze their block indices).
    @pl.when(aflag_ref[e] == 1)
    def _():
        kp = gq_ref.shape[1]          # K // 8
        tn = gq_ref.shape[2]
        nt8 = dq_ref.shape[1]         # TN // 8
        tt = xp_ref.shape[0]

        xp = xp_ref[...]              # (TT, K) bf16
        gq = gq_ref[0]                # (Kp, TN) int32
        uq = uq_ref[0]
        gs = gs_ref[0]                # (1, TN) f32
        us = us_ref[0]

        # --- gate / up: per-nibble dequant fused with MXU dots (no interleave reshape).
        gate = jnp.zeros((tt, tn), jnp.float32)
        up = jnp.zeros((tt, tn), jnp.float32)
        for j in range(8):
            xj = xp[:, j * kp:(j + 1) * kp]                              # (TT, Kp) bf16
            qg = ((gq >> (4 * j)) & 0xF) - 8                             # nibble -> [-8, 7]
            qu = ((uq >> (4 * j)) & 0xF) - 8
            wg = (qg.astype(jnp.float32) * gs).astype(jnp.bfloat16)      # (Kp, TN)
            wu = (qu.astype(jnp.float32) * us).astype(jnp.bfloat16)
            gate = gate + jnp.dot(xj, wg, preferred_element_type=jnp.float32)
            up = up + jnp.dot(xj, wu, preferred_element_type=jnp.float32)

        # SiLU(gate) * up, routed before the down matmul (no per-expert scratch needed).
        act = gate * jax.nn.sigmoid(gate) * up                           # (TT, TN) f32
        act = act * route_ref[0]                                         # (TT, 1) broadcast
        act_b = act.astype(jnp.bfloat16)

        # --- down: per-nibble dequant + dots; act columns are already nibble-major.
        dq = dq_ref[0]                # (TN//8, K) int32
        ds = ds_ref[0]                # (1, K) f32
        partial = jnp.zeros(acc_ref.shape, jnp.float32)
        for j in range(8):
            aj = act_b[:, j * nt8:(j + 1) * nt8]                         # (TT, TN//8) bf16
            qd = ((dq >> (4 * j)) & 0xF) - 8
            wd = (qd.astype(jnp.float32) * ds).astype(jnp.bfloat16)      # (TN//8, K)
            partial = partial + jnp.dot(aj, wd, preferred_element_type=jnp.float32)
        acc_ref[...] += partial

    @pl.when((e == last_e) & (n == last_n))
    def _():
        o_ref[...] = acc_ref[...].astype(o_ref.dtype)


def fused_marlin_moe_pallas(x, gate_qw, gate_s, up_qw, up_s, down_qw, down_s,
                            route_dense, *, tn):
    """x: (T, K); packed 4-bit expert weights (gate/up already nibble-col-permuted for
    tile size `tn`) + scales; route_dense: (T, E) f32 dense routing weights."""
    T, K = x.shape
    E, Kp, N = gate_qw.shape
    assert Kp * 8 == K and down_qw.shape == (E, N // 8, K)
    assert N % tn == 0 and tn % 8 == 0

    kind = _device_kind()
    tt = _pick_tt(T, kind)
    assert T % tt == 0  # TODO(synk): pad arbitrary token counts host-side.

    num_n = N // tn
    last_n = num_n - 1
    grid = (T // tt, E, num_n)

    # Nibble-major permutation of x's K axis (+ bf16 cast, once) so nibble j of the
    # packed gate/up weights contracts against a contiguous (TT, K//8) slab.
    xp = x.reshape(T, Kp, 8).transpose(0, 2, 1).reshape(T, K).astype(jnp.bfloat16)

    route_e = jnp.transpose(route_dense)[:, :, None]                     # (E, T, 1)

    # Active-expert compaction.  Routing weights from softmax top-k are strictly > 0
    # for selected experts, so "any routed mass > 0" == "expert was selected".
    active = jnp.max(route_dense, axis=0) > 0.0                          # (E,)
    order = jnp.argsort(jnp.logical_not(active).astype(jnp.int32))       # active first
    num_active = jnp.sum(active.astype(jnp.int32))
    last_active = order[jnp.maximum(num_active - 1, 0)]
    slots = jnp.arange(E, dtype=jnp.int32)
    eids = jnp.where(slots < num_active, order.astype(jnp.int32),
                     last_active).astype(jnp.int32)                      # (E,)
    aflag = (slots < num_active).astype(jnp.int32)                       # (E,)
    # Freeze the N-tile index for inactive slots so the block index repeats and the
    # pipeline skips the weight DMAs entirely.
    neff = jnp.where(slots[:, None] < num_active,
                     jnp.broadcast_to(jnp.arange(num_n, dtype=jnp.int32), (E, num_n)),
                     jnp.int32(last_n)).astype(jnp.int32)                # (E, num_n)

    def wmap_n(t, e, n, eids, neff, aflag):        # gate/up qweight & scales (tiled on N)
        return (eids[e], 0, neff[e, n])

    def wmap_dq(t, e, n, eids, neff, aflag):       # down qweight (packed rows tiled on N)
        return (eids[e], neff[e, n], 0)

    def wmap_ds(t, e, n, eids, neff, aflag):       # down scales
        return (eids[e], 0, 0)

    def xmap(t, e, n, eids, neff, aflag):          # x / output (resident over e, n)
        return (t, 0)

    def rmap(t, e, n, eids, neff, aflag):          # routing weights
        return (eids[e], t, 0)

    cost = pl.CostEstimate(
        flops=6 * T * K * N * E,
        transcendentals=T * N * E,
        bytes_accessed=int(4 * (gate_qw.size + up_qw.size + down_qw.size
                                + gate_s.size + up_s.size + down_s.size)
                           + 2 * xp.size + 4 * x.size))

    vmem_limit = None
    if "v7" in kind:
        vmem_limit = 48 * 1024 * 1024        # 64 MiB physical VMEM on v7x
    elif "v5 lite" in kind or "v5e" in kind or "v6" in kind:
        vmem_limit = 96 * 1024 * 1024        # 128 MiB physical VMEM on v5e/v6e

    return pl.pallas_call(
        _moe_kernel,
        out_shape=jax.ShapeDtypeStruct((T, K), x.dtype),
        grid_spec=pltpu.PrefetchScalarGridSpec(
            num_scalar_prefetch=3,
            grid=grid,
            in_specs=[
                pl.BlockSpec((tt, K), xmap),                 # x (bf16, nibble-permuted K)
                pl.BlockSpec((1, Kp, tn), wmap_n),           # gate qweight
                pl.BlockSpec((1, 1, tn), wmap_n),            # gate scales
                pl.BlockSpec((1, Kp, tn), wmap_n),           # up qweight
                pl.BlockSpec((1, 1, tn), wmap_n),            # up scales
                pl.BlockSpec((1, tn // 8, K), wmap_dq),      # down qweight
                pl.BlockSpec((1, 1, K), wmap_ds),            # down scales
                pl.BlockSpec((1, tt, 1), rmap),              # routing weights
            ],
            out_specs=pl.BlockSpec((tt, K), xmap),           # resident output
            scratch_shapes=[pltpu.VMEM((tt, K), jnp.float32)],   # routed-sum accumulator
        ),
        compiler_params=pltpu.CompilerParams(
            dimension_semantics=("parallel", "arbitrary", "arbitrary"),
            vmem_limit_bytes=vmem_limit,
        ),
        cost_estimate=cost,
    )(eids, neff, aflag, xp, gate_qw, gate_s, up_qw, up_s, down_qw, down_s, route_e)


# ----------------------------- module equivalent ---------------------------------------

class GPTQMarlinSparseMoELayerPallas:
    """JAX/Pallas equivalent of GPTQMarlinSparseMoELayer (softmax scoring, symmetric
    GPTQ 4-bit, full-K quantization group, n_expert_group=None)."""

    def __init__(self, *, n_experts, hidden, intermediate, topk, renormalize, key):
        assert hidden % 8 == 0 and intermediate % 8 == 0
        self.topk = topk
        self.renormalize = renormalize
        self.bits = 4
        k1, k2, k3, k4, k5, k6 = jax.random.split(key, 6)

        # gate / up: in=K(hidden), out=N(intermediate), stored separately so the
        # gate/up split never cuts across a lane tile.
        q_g = jax.random.randint(k1, (n_experts, hidden, intermediate), 0, 16, jnp.int32)
        q_u = jax.random.randint(k2, (n_experts, hidden, intermediate), 0, 16, jnp.int32)
        self.gate_qweight = pack_int4(q_g)                                  # (E, K//8, N)
        self.up_qweight = pack_int4(q_u)
        self.gate_scales = jax.random.uniform(
            k3, (n_experts, 1, intermediate), jnp.float32, 0.01, 0.03)
        self.up_scales = jax.random.uniform(
            k4, (n_experts, 1, intermediate), jnp.float32, 0.01, 0.03)

        # down: in=N(intermediate), out=K(hidden).
        q_d = jax.random.randint(k5, (n_experts, intermediate, hidden), 0, 16, jnp.int32)
        self.down_qweight = pack_int4(q_d)                                  # (E, N//8, K)
        self.down_scales = jax.random.uniform(
            k6, (n_experts, 1, hidden), jnp.float32, 0.01, 0.03)
        # symmetric GPTQ -> qzeros empty; g_idx / marlin perm are identity (no act-order).

        # Kernel-layout copies: gate/up columns permuted per N tile into nibble-major
        # order so the kernel's down matmul consumes contiguous column blocks.
        self._tn = _pick_tn(intermediate, _device_kind())
        perm = _nibble_col_perm(intermediate, self._tn)
        self._gate_qw_k = self.gate_qweight[:, :, perm]
        self._up_qw_k = self.up_qweight[:, :, perm]
        self._gate_s_k = self.gate_scales[:, :, perm]
        self._up_s_k = self.up_scales[:, :, perm]

    def __call__(self, x, *, gating_output):
        route_dense = topk_softmax_routing(gating_output, self.topk, self.renormalize)
        return fused_marlin_moe_pallas(
            x, self._gate_qw_k, self._gate_s_k, self._up_qw_k, self._up_s_k,
            self.down_qweight, self.down_scales, route_dense, tn=self._tn)

    def reference(self, x, *, gating_output):
        """Pure-JAX reference mirroring the kernel's dtype choices (unpermuted weights)."""
        route = topk_softmax_routing(gating_output, self.topk, self.renormalize)   # (T, E)
        wg = dequant_gptq_sym_bf16(self.gate_qweight, self.gate_scales)            # (E, K, N)
        wu = dequant_gptq_sym_bf16(self.up_qweight, self.up_scales)                # (E, K, N)
        wd = dequant_gptq_sym_bf16(self.down_qweight, self.down_scales)            # (E, N, K)
        xb = x.astype(jnp.bfloat16)
        gate = jnp.einsum("tk,ekn->etn", xb, wg, preferred_element_type=jnp.float32)
        up = jnp.einsum("tk,ekn->etn", xb, wu, preferred_element_type=jnp.float32)
        act = gate * jax.nn.sigmoid(gate) * up                                     # (E, T, N)
        act = act * jnp.transpose(route)[:, :, None]      # route before bf16 (like kernel)
        out = jnp.einsum("etn,enk->tk", act.astype(jnp.bfloat16), wd,
                         preferred_element_type=jnp.float32)
        return out.astype(x.dtype)


if __name__ == "__main__":
    # Small TPU-friendly shapes: 48 tokens, hidden=256, intermediate=384, 8 experts, topk=2.
    # Chosen so the kernel exercises multiple token tiles, multiple N tiles, and the
    # inactive-expert skip path.
    T, HIDDEN, INTER, E, TOPK = 48, 256, 384, 8, 2

    key = jax.random.PRNGKey(0)
    k_layer, k_x, k_gate = jax.random.split(key, 3)

    layer = GPTQMarlinSparseMoELayerPallas(
        n_experts=E, hidden=HIDDEN, intermediate=INTER, topk=TOPK,
        renormalize=True, key=k_layer)

    x = jax.random.normal(k_x, (T, HIDDEN), jnp.float32)
    gating_output = jax.random.normal(k_gate, (T, E), jnp.float32)
    # Deterministically de-route the last two experts so the inactive-expert
    # DMA-skip / compute-skip path is exercised.
    gating_output = gating_output.at[:, -2:].add(-1.0e4)

    fwd = jax.jit(lambda xx, gg: layer(xx, gating_output=gg))
    out = jax.block_until_ready(fwd(x, gating_output))
    ref = jax.block_until_ready(layer.reference(x, gating_output=gating_output))

    assert out.shape == (T, HIDDEN)
    max_err = float(jnp.max(jnp.abs(out - ref)))
    assert jnp.allclose(out, ref, atol=3e-3, rtol=3e-3), f"Pallas MoE mismatch, max_err={max_err}"

    print("KERNEL_OK")
</pallas_src>

<mosaic_0001>
module attributes {stable_mosaic.version = 11 : i64} {
  func.func private @main(%arg0: i32) attributes {dimension_semantics = [#tpu.dimension_semantics<core_parallel>], iteration_bounds = array<i64: 2>, tpu.core_type = #tpu.core_type<sc_scalar_subcore>, window_params = []} {
    return
  }
}

module attributes {stable_mosaic.version = 11 : i64} {
  func.func private @main(%arg0: i32) attributes {dimension_semantics = [#tpu.dimension_semantics<core_parallel>], iteration_bounds = array<i64: 2>, tpu.core_type = #tpu.core_type<sc_scalar_subcore>, window_params = []} {
    return
  }
}

module attributes {stable_mosaic.version = 11 : i64} {
  func.func @_moe_kernel(%arg0: i32, %arg1: i32, %arg2: i32, %arg3: memref<8xi32, #tpu.memory_space<smem>>, %arg4: memref<8x3xi32, #tpu.memory_space<smem>>, %arg5: memref<8xi32, #tpu.memory_space<smem>>, %arg6: memref<16x256xbf16, #tpu.memory_space<vmem>>, %arg7: memref<1x32x128xi32, #tpu.memory_space<vmem>>, %arg8: memref<1x1x128xf32, #tpu.memory_space<vmem>>, %arg9: memref<1x32x128xi32, #tpu.memory_space<vmem>>, %arg10: memref<1x1x128xf32, #tpu.memory_space<vmem>>, %arg11: memref<1x16x256xi32, #tpu.memory_space<vmem>>, %arg12: memref<1x1x256xf32, #tpu.memory_space<vmem>>, %arg13: memref<1x16x1xf32, #tpu.memory_space<vmem>>, %arg14: memref<16x256xf32, #tpu.memory_space<vmem>>, %arg15: memref<16x256xf32, #tpu.memory_space<vmem>>) attributes {dimension_semantics = [#tpu.dimension_semantics<parallel>, #tpu.dimension_semantics<arbitrary>, #tpu.dimension_semantics<arbitrary>], iteration_bounds = array<i64: 3, 8, 3>, scalar_prefetch = 3 : i64, scratch_operands = 1 : i64, tpu.core_type = #tpu.core_type<tc>, window_params = [{transform_indices = @transform_0, window_bounds = array<i64: 16, 256>}, {transform_indices = @transform_1, window_bounds = array<i64: 1, 32, 128>}, {transform_indices = @transform_2, window_bounds = array<i64: 1, 1, 128>}, {transform_indices = @transform_3, window_bounds = array<i64: 1, 32, 128>}, {transform_indices = @transform_4, window_bounds = array<i64: 1, 1, 128>}, {transform_indices = @transform_5, window_bounds = array<i64: 1, 16, 256>}, {transform_indices = @transform_6, window_bounds = array<i64: 1, 1, 256>}, {transform_indices = @transform_7, window_bounds = array<i64: 1, 16, 1>}, {transform_indices = @transform_8, window_bounds = array<i64: 16, 256>}]} {
    %c0_i32 = arith.constant 0 : i32
    %0 = arith.cmpi eq, %arg1, %c0_i32 : i32
    %c0_i32_0 = arith.constant 0 : i32
    %1 = arith.cmpi eq, %arg2, %c0_i32_0 : i32
    %2 = arith.andi %0, %1 : i1
    %3 = arith.extui %2 : i1 to i32
    %c0_i32_1 = arith.constant 0 : i32
    %4 = arith.cmpi ne, %3, %c0_i32_1 : i32
    scf.if %4 {
      %cst = arith.constant 0.000000e+00 : f32
      %15 = vector.broadcast %cst : f32 to vector<16x256xf32>
      %c0 = arith.constant 0 : index
      %c0_4 = arith.constant 0 : index
      %16 = vector.load %arg15[%c0, %c0_4] : memref<16x256xf32, #tpu.memory_space<vmem>>, vector<16x256xf32>
      tpu.vector_store %arg15[%c0, %c0_4], %15 {strides = array<i32>} : memref<16x256xf32, #tpu.memory_space<vmem>>, vector<16x256xf32>,
    } else {
    }
    %5 = arith.index_cast %arg1 : i32 to index
    %6 = memref.load %arg5[%5] : memref<8xi32, #tpu.memory_space<smem>>
    %c1_i32 = arith.constant 1 : i32
    %7 = arith.cmpi eq, %6, %c1_i32 : i32
    %8 = arith.extui %7 : i1 to i32
    %c0_i32_2 = arith.constant 0 : i32
    %9 = arith.cmpi ne, %8, %c0_i32_2 : i32
    scf.if %9 {
      %c0 = arith.constant 0 : index
      %c0_4 = arith.constant 0 : index
      %15 = vector.load %arg6[%c0, %c0_4] : memref<16x256xbf16, #tpu.memory_space<vmem>>, vector<16x256xbf16>
      %c0_5 = arith.constant 0 : index
      %c0_6 = arith.constant 0 : index
      %c0_7 = arith.constant 0 : index
      %16 = vector.load %arg7[%c0_5, %c0_6, %c0_7] : memref<1x32x128xi32, #tpu.memory_space<vmem>>, vector<1x32x128xi32>
      %17 = vector.shape_cast %16 : vector<1x32x128xi32> to vector<32x128xi32>
      %c0_8 = arith.constant 0 : index
      %c0_9 = arith.constant 0 : index
      %c0_10 = arith.constant 0 : index
      %18 = vector.load %arg9[%c0_8, %c0_9, %c0_10] : memref<1x32x128xi32, #tpu.memory_space<vmem>>, vector<1x32x128xi32>
      %19 = vector.shape_cast %18 : vector<1x32x128xi32> to vector<32x128xi32>
      %c0_11 = arith.constant 0 : index
      %c0_12 = arith.constant 0 : index
      %c0_13 = arith.constant 0 : index
      %20 = vector.load %arg8[%c0_11, %c0_12, %c0_13] : memref<1x1x128xf32, #tpu.memory_space<vmem>>, vector<1x1x128xf32>
      %21 = vector.shape_cast %20 : vector<1x1x128xf32> to vector<1x128xf32>
      %c0_14 = arith.constant 0 : index
      %c0_15 = arith.constant 0 : index
      %c0_16 = arith.constant 0 : index
      %22 = vector.load %arg10[%c0_14, %c0_15, %c0_16] : memref<1x1x128xf32, #tpu.memory_space<vmem>>, vector<1x1x128xf32>
      %23 = vector.shape_cast %22 : vector<1x1x128xf32> to vector<1x128xf32>
      %cst = arith.constant 0.000000e+00 : f32
      %24 = vector.broadcast %cst : f32 to vector<16x128xf32>
      %cst_17 = arith.constant 0.000000e+00 : f32
      %25 = vector.broadcast %cst_17 : f32 to vector<16x128xf32>
      %26 = vector.extract_strided_slice %15 {offsets = [0, 0], sizes = [16, 32], strides = [1, 1]} : vector<16x256xbf16> to vector<16x32xbf16>
      %c0_i32_18 = arith.constant 0 : i32
      %27 = vector.broadcast %c0_i32_18 : i32 to vector<32x128xi32>
      %28 = arith.shrsi %17, %27 : vector<32x128xi32>
      %c15_i32 = arith.constant 15 : i32
      %29 = vector.broadcast %c15_i32 : i32 to vector<32x128xi32>
      %30 = arith.andi %28, %29 : vector<32x128xi32>
      %c8_i32 = arith.constant 8 : i32
      %31 = vector.broadcast %c8_i32 : i32 to vector<32x128xi32>
      %32 = arith.subi %30, %31 : vector<32x128xi32>
      %c0_i32_19 = arith.constant 0 : i32
      %33 = vector.broadcast %c0_i32_19 : i32 to vector<32x128xi32>
      %34 = arith.shrsi %19, %33 : vector<32x128xi32>
      %c15_i32_20 = arith.constant 15 : i32
      %35 = vector.broadcast %c15_i32_20 : i32 to vector<32x128xi32>
      %36 = arith.andi %34, %35 : vector<32x128xi32>
      %c8_i32_21 = arith.constant 8 : i32
      %37 = vector.broadcast %c8_i32_21 : i32 to vector<32x128xi32>
      %38 = arith.subi %36, %37 : vector<32x128xi32>
      %39 = arith.sitofp %32 : vector<32x128xi32> to vector<32x128xf32>
      %40 = vector.broadcast %21 : vector<1x128xf32> to vector<32x128xf32>
      %41 = arith.mulf %39, %40 : vector<32x128xf32>
      %42 = arith.truncf %41 : vector<32x128xf32> to vector<32x128xbf16>
      %43 = arith.sitofp %38 : vector<32x128xi32> to vector<32x128xf32>
      %44 = vector.broadcast %23 : vector<1x128xf32> to vector<32x128xf32>
      %45 = arith.mulf %43, %44 : vector<32x128xf32>
      %46 = arith.truncf %45 : vector<32x128xf32> to vector<32x128xbf16>
      %cst_22 = arith.constant dense<0.000000e+00> : vector<16x128xf32>
      %47 = tpu.matmul %26, %42, %cst_22 {dimension_numbers = #tpu.dot_dimension_numbers<[1], [0], [0], [1], [0, 0, 1, 1], [], []>} : vector<16x32xbf16>, vector<32x128xbf16>, vector<16x128xf32> -> vector<16x128xf32>
      %48 = arith.addf %24, %47 : vector<16x128xf32>
      %cst_23 = arith.constant dense<0.000000e+00> : vector<16x128xf32>
      %49 = tpu.matmul %26, %46, %cst_23 {dimension_numbers = #tpu.dot_dimension_numbers<[1], [0], [0], [1], [0, 0, 1, 1], [], []>} : vector<16x32xbf16>, vector<32x128xbf16>, vector<16x128xf32> -> vector<16x128xf32>
      %50 = arith.addf %25, %49 : vector<16x128xf32>
      %51 = vector.extract_strided_slice %15 {offsets = [0, 32], sizes = [16, 32], strides = [1, 1]} : vector<16x256xbf16> to vector<16x32xbf16>
      %c4_i32 = arith.constant 4 : i32
      %52 = vector.broadcast %c4_i32 : i32 to vector<32x128xi32>
      %53 = arith.shrsi %17, %52 : vector<32x128xi32>
      %c15_i32_24 = arith.constant 15 : i32
      %54 = vector.broadcast %c15_i32_24 : i32 to vector<32x128xi32>
      %55 = arith.andi %53, %54 : vector<32x128xi32>
      %c8_i32_25 = arith.constant 8 : i32
      %56 = vector.broadcast %c8_i32_25 : i32 to vector<32x128xi32>
      %57 = arith.subi %55, %56 : vector<32x128xi32>
      %c4_i32_26 = arith.constant 4 : i32
      %58 = vector.broadcast %c4_i32_26 : i32 to vector<32x128xi32>
      %59 = arith.shrsi %19, %58 : vector<32x128xi32>
      %c15_i32_27 = arith.constant 15 : i32
      %60 = vector.broadcast %c15_i32_27 : i32 to vector<32x128xi32>
      %61 = arith.andi %59, %60 : vector<32x128xi32>
      %c8_i32_28 = arith.constant 8 : i32
      %62 = vector.broadcast %c8_i32_28 : i32 to vector<32x128xi32>
      %63 = arith.subi %61, %62 : vector<32x128xi32>
      %64 = arith.sitofp %57 : vector<32x128xi32> to vector<32x128xf32>
      %65 = vector.broadcast %21 : vector<1x128xf32> to vector<32x128xf32>
      %66 = arith.mulf %64, %65 : vector<32x128xf32>
      %67 = arith.truncf %66 : vector<32x128xf32> to vector<32x128xbf16>
      %68 = arith.sitofp %63 : vector<32x128xi32> to vector<32x128xf32>
      %69 = vector.broadcast %23 : vector<1x128xf32> to vector<32x128xf32>
      %70 = arith.mulf %68, %69 : vector<32x128xf32>
      %71 = arith.truncf %70 : vector<32x128xf32> to vector<32x128xbf16>
      %cst_29 = arith.constant dense<0.000000e+00> : vector<16x128xf32>
      %72 = tpu.matmul %51, %67, %cst_29 {dimension_numbers = #tpu.dot_dimension_numbers<[1], [0], [0], [1], [0, 0, 1, 1], [], []>} : vector<16x32xbf16>, vector<32x128xbf16>, vector<16x128xf32> -> vector<16x128xf32>
      %73 = arith.addf %48, %72 : vector<16x128xf32>
      %cst_30 = arith.constant dense<0.000000e+00> : vector<16x128xf32>
      %74 = tpu.matmul %51, %71, %cst_30 {dimension_numbers = #tpu.dot_dimension_numbers<[1], [0], [0], [1], [0, 0, 1, 1], [], []>} : vector<16x32xbf16>, vector<32x128xbf16>, vector<16x128xf32> -> vector<16x128xf32>
      %75 = arith.addf %50, %74 : vector<16x128xf32>
      %76 = vector.extract_strided_slice %15 {offsets = [0, 64], sizes = [16, 32], strides = [1, 1]} : vector<16x256xbf16> to vector<16x32xbf16>
      %c8_i32_31 = arith.constant 8 : i32
      %77 = vector.broadcast %c8_i32_31 : i32 to vector<32x128xi32>
      %78 = arith.shrsi %17, %77 : vector<32x128xi32>
      %c15_i32_32 = arith.constant 15 : i32
      %79 = vector.broadcast %c15_i32_32 : i32 to vector<32x128xi32>
      %80 = arith.andi %78, %79 : vector<32x128xi32>
      %c8_i32_33 = arith.constant 8 : i32
      %81 = vector.broadcast %c8_i32_33 : i32 to vector<32x128xi32>
      %82 = arith.subi %80, %81 : vector<32x128xi32>
      %c8_i32_34 = arith.constant 8 : i32
      %83 = vector.broadcast %c8_i32_34 : i32 to vector<32x128xi32>
      %84 = arith.shrsi %19, %83 : vector<32x128xi32>
      %c15_i32_35 = arith.constant 15 : i32
      %85 = vector.broadcast %c15_i32_35 : i32 to vector<32x128xi32>
      %86 = arith.andi %84, %85 : vector<32x128xi32>
      %c8_i32_36 = arith.constant 8 : i32
      %87 = vector.broadcast %c8_i32_36 : i32 to vector<32x128xi32>
      %88 = arith.subi %86, %87 : vector<32x128xi32>
      %89 = arith.sitofp %82 : vector<32x128xi32> to vector<32x128xf32>
      %90 = vector.broadcast %21 : vector<1x128xf32> to vector<32x128xf32>
      %91 = arith.mulf %89, %90 : vector<32x128xf32>
      %92 = arith.truncf %91 : vector<32x128xf32> to vector<32x128xbf16>
      %93 = arith.sitofp %88 : vector<32x128xi32> to vector<32x128xf32>
      %94 = vector.broadcast %23 : vector<1x128xf32> to vector<32x128xf32>
      %95 = arith.mulf %93, %94 : vector<32x128xf32>
      %96 = arith.truncf %95 : vector<32x128xf32> to vector<32x128xbf16>
      %cst_37 = arith.constant dense<0.000000e+00> : vector<16x128xf32>
      %97 = tpu.matmul %76, %92, %cst_37 {dimension_numbers = #tpu.dot_dimension_numbers<[1], [0], [0], [1], [0, 0, 1, 1], [], []>} : vector<16x32xbf16>, vector<32x128xbf16>, vector<16x128xf32> -> vector<16x128xf32>
      %98 = arith.addf %73, %97 : vector<16x128xf32>
      %cst_38 = arith.constant dense<0.000000e+00> : vector<16x128xf32>
      %99 = tpu.matmul %76, %96, %cst_38 {dimension_numbers = #tpu.dot_dimension_numbers<[1], [0], [0], [1], [0, 0, 1, 1], [], []>} : vector<16x32xbf16>, vector<32x128xbf16>, vector<16x128xf32> -> vector<16x128xf32>
      %100 = arith.addf %75, %99 : vector<16x128xf32>
      %101 = vector.extract_strided_slice %15 {offsets = [0, 96], sizes = [16, 32], strides = [1, 1]} : vector<16x256xbf16> to vector<16x32xbf16>
      %c12_i32 = arith.constant 12 : i32
      %102 = vector.broadcast %c12_i32 : i32 to vector<32x128xi32>
      %103 = arith.shrsi %17, %102 : vector<32x128xi32>
      %c15_i32_39 = arith.constant 15 : i32
      %104 = vector.broadcast %c15_i32_39 : i32 to vector<32x128xi32>
      %105 = arith.andi %103, %104 : vector<32x128xi32>
      %c8_i32_40 = arith.constant 8 : i32
      %106 = vector.broadcast %c8_i32_40 : i32 to vector<32x128xi32>
      %107 = arith.subi %105, %106 : vector<32x128xi32>
      %c12_i32_41 = arith.constant 12 : i32
      %108 = vector.broadcast %c12_i32_41 : i32 to vector<32x128xi32>
      %109 = arith.shrsi %19, %108 : vector<32x128xi32>
      %c15_i32_42 = arith.constant 15 : i32
      %110 = vector.broadcast %c15_i32_42 : i32 to vector<32x128xi32>
      %111 = arith.andi %109, %110 : vector<32x128xi32>
      %c8_i32_43 = arith.constant 8 : i32
      %112 = vector.broadcast %c8_i32_43 : i32 to vector<32x128xi32>
      %113 = arith.subi %111, %112 : vector<32x128xi32>
      %114 = arith.sitofp %107 : vector<32x128xi32> to vector<32x128xf32>
      %115 = vector.broadcast %21 : vector<1x128xf32> to vector<32x128xf32>
      %116 = arith.mulf %114, %115 : vector<32x128xf32>
      %117 = arith.truncf %116 : vector<32x128xf32> to vector<32x128xbf16>
      %118 = arith.sitofp %113 : vector<32x128xi32> to vector<32x128xf32>
      %119 = vector.broadcast %23 : vector<1x128xf32> to vector<32x128xf32>
      %120 = arith.mulf %118, %119 : vector<32x128xf32>
      %121 = arith.truncf %120 : vector<32x128xf32> to vector<32x128xbf16>
      %cst_44 = arith.constant dense<0.000000e+00> : vector<16x128xf32>
      %122 = tpu.matmul %101, %117, %cst_44 {dimension_numbers = #tpu.dot_dimension_numbers<[1], [0], [0], [1], [0, 0, 1, 1], [], []>} : vector<16x32xbf16>, vector<32x128xbf16>, vector<16x128xf32> -> vector<16x128xf32>
      %123 = arith.addf %98, %122 : vector<16x128xf32>
      %cst_45 = arith.constant dense<0.000000e+00> : vector<16x128xf32>
      %124 = tpu.matmul %101, %121, %cst_45 {dimension_numbers = #tpu.dot_dimension_numbers<[1], [0], [0], [1], [0, 0, 1, 1], [], []>} : vector<16x32xbf16>, vector<32x128xbf16>, vector<16x128xf32> -> vector<16x128xf32>
      %125 = arith.addf %100, %124 : vector<16x128xf32>
      %126 = vector.extract_strided_slice %15 {offsets = [0, 128], sizes = [16, 32], strides = [1, 1]} : vector<16x256xbf16> to vector<16x32xbf16>
      %c16_i32 = arith.constant 16 : i32
      %127 = vector.broadcast %c16_i32 : i32 to vector<32x128xi32>
      %128 = arith.shrsi %17, %127 : vector<32x128xi32>
      %c15_i32_46 = arith.constant 15 : i32
      %129 = vector.broadcast %c15_i32_46 : i32 to vector<32x128xi32>
      %130 = arith.andi %128, %129 : vector<32x128xi32>
      %c8_i32_47 = arith.constant 8 : i32
      %131 = vector.broadcast %c8_i32_47 : i32 to vector<32x128xi32>
      %132 = arith.subi %130, %131 : vector<32x128xi32>
      %c16_i32_48 = arith.constant 16 : i32
      %133 = vector.broadcast %c16_i32_48 : i32 to vector<32x128xi32>
      %134 = arith.shrsi %19, %133 : vector<32x128xi32>
      %c15_i32_49 = arith.constant 15 : i32
      %135 = vector.broadcast %c15_i32_49 : i32 to vector<32x128xi32>
      %136 = arith.andi %134, %135 : vector<32x128xi32>
      %c8_i32_50 = arith.constant 8 : i32
      %137 = vector.broadcast %c8_i32_50 : i32 to vector<32x128xi32>
      %138 = arith.subi %136, %137 : vector<32x128xi32>
      %139 = arith.sitofp %132 : vector<32x128xi32> to vector<32x128xf32>
      %140 = vector.broadcast %21 : vector<1x128xf32> to vector<32x128xf32>
      %141 = arith.mulf %139, %140 : vector<32x128xf32>
      %142 = arith.truncf %141 : vector<32x128xf32> to vector<32x128xbf16>
      %143 = arith.sitofp %138 : vector<32x128xi32> to vector<32x128xf32>
      %144 = vector.broadcast %23 : vector<1x128xf32> to vector<32x128xf32>
      %145 = arith.mulf %143, %144 : vector<32x128xf32>
      %146 = arith.truncf %145 : vector<32x128xf32> to vector<32x128xbf16>
      %cst_51 = arith.constant dense<0.000000e+00> : vector<16x128xf32>
      %147 = tpu.matmul %126, %142, %cst_51 {dimension_numbers = #tpu.dot_dimension_numbers<[1], [0], [0], [1], [0, 0, 1, 1], [], []>} : vector<16x32xbf16>, vector<32x128xbf16>, vector<16x128xf32> -> vector<16x128xf32>
      %148 = arith.addf %123, %147 : vector<16x128xf32>
      %cst_52 = arith.constant dense<0.000000e+00> : vector<16x128xf32>
      %149 = tpu.matmul %126, %146, %cst_52 {dimension_numbers = #tpu.dot_dimension_numbers<[1], [0], [0], [1], [0, 0, 1, 1], [], []>} : vector<16x32xbf16>, vector<32x128xbf16>, vector<16x128xf32> -> vector<16x128xf32>
      %150 = arith.addf %125, %149 : vector<16x128xf32>
      %151 = vector.extract_strided_slice %15 {offsets = [0, 160], sizes = [16, 32], strides = [1, 1]} : vector<16x256xbf16> to vector<16x32xbf16>
      %c20_i32 = arith.constant 20 : i32
      %152 = vector.broadcast %c20_i32 : i32 to vector<32x128xi32>
      %153 = arith.shrsi %17, %152 : vector<32x128xi32>
      %c15_i32_53 = arith.constant 15 : i32
      %154 = vector.broadcast %c15_i32_53 : i32 to vector<32x128xi32>
      %155 = arith.andi %153, %154 : vector<32x128xi32>
      %c8_i32_54 = arith.constant 8 : i32
      %156 = vector.broadcast %c8_i32_54 : i32 to vector<32x128xi32>
      %157 = arith.subi %155, %156 : vector<32x128xi32>
      %c20_i32_55 = arith.constant 20 : i32
      %158 = vector.broadcast %c20_i32_55 : i32 to vector<32x128xi32>
      %159 = arith.shrsi %19, %158 : vector<32x128xi32>
      %c15_i32_56 = arith.constant 15 : i32
      %160 = vector.broadcast %c15_i32_56 : i32 to vector<32x128xi32>
      %161 = arith.andi %159, %160 : vector<32x128xi32>
      %c8_i32_57 = arith.constant 8 : i32
      %162 = vector.broadcast %c8_i32_57 : i32 to vector<32x128xi32>
      %163 = arith.subi %161, %162 : vector<32x128xi32>
      %164 = arith.sitofp %157 : vector<32x128xi32> to vector<32x128xf32>
      %165 = vector.broadcast %21 : vector<1x128xf32> to vector<32x128xf32>
      %166 = arith.mulf %164, %165 : vector<32x128xf32>
      %167 = arith.truncf %166 : vector<32x128xf32> to vector<32x128xbf16>
      %168 = arith.sitofp %163 : vector<32x128xi32> to vector<32x128xf32>
      %169 = vector.broadcast %23 : vector<1x128xf32> to vector<32x128xf32>
      %170 = arith.mulf %168, %169 : vector<32x128xf32>
      %171 = arith.truncf %170 : vector<32x128xf32> to vector<32x128xbf16>
      %cst_58 = arith.constant dense<0.000000e+00> : vector<16x128xf32>
      %172 = tpu.matmul %151, %167, %cst_58 {dimension_numbers = #tpu.dot_dimension_numbers<[1], [0], [0], [1], [0, 0, 1, 1], [], []>} : vector<16x32xbf16>, vector<32x128xbf16>, vector<16x128xf32> -> vector<16x128xf32>
      %173 = arith.addf %148, %172 : vector<16x128xf32>
      %cst_59 = arith.constant dense<0.000000e+00> : vector<16x128xf32>
      %174 = tpu.matmul %151, %171, %cst_59 {dimension_numbers = #tpu.dot_dimension_numbers<[1], [0], [0], [1], [0, 0, 1, 1], [], []>} : vector<16x32xbf16>, vector<32x128xbf16>, vector<16x128xf32> -> vector<16x128xf32>
      %175 = arith.addf %150, %174 : vector<16x128xf32>
      %176 = vector.extract_strided_slice %15 {offsets = [0, 192], sizes = [16, 32], strides = [1, 1]} : vector<16x256xbf16> to vector<16x32xbf16>
      %c24_i32 = arith.constant 24 : i32
      %177 = vector.broadcast %c24_i32 : i32 to vector<32x128xi32>
      %178 = arith.shrsi %17, %177 : vector<32x128xi32>
      %c15_i32_60 = arith.constant 15 : i32
      %179 = vector.broadcast %c15_i32_60 : i32 to vector<32x128xi32>
      %180 = arith.andi %178, %179 : vector<32x128xi32>
      %c8_i32_61 = arith.constant 8 : i32
      %181 = vector.broadcast %c8_i32_61 : i32 to vector<32x128xi32>
      %182 = arith.subi %180, %181 : vector<32x128xi32>
      %c24_i32_62 = arith.constant 24 : i32
      %183 = vector.broadcast %c24_i32_62 : i32 to vector<32x128xi32>
      %184 = arith.shrsi %19, %183 : vector<32x128xi32>
      %c15_i32_63 = arith.constant 15 : i32
      %185 = vector.broadcast %c15_i32_63 : i32 to vector<32x128xi32>
      %186 = arith.andi %184, %185 : vector<32x128xi32>
      %c8_i32_64 = arith.constant 8 : i32
      %187 = vector.broadcast %c8_i32_64 : i32 to vector<32x128xi32>
      %188 = arith.subi %186, %187 : vector<32x128xi32>
      %189 = arith.sitofp %182 : vector<32x128xi32> to vector<32x128xf32>
      %190 = vector.broadcast %21 : vector<1x128xf32> to vector<32x128xf32>
      %191 = arith.mulf %189, %190 : vector<32x128xf32>
      %192 = arith.truncf %191 : vector<32x128xf32> to vector<32x128xbf16>
      %193 = arith.sitofp %188 : vector<32x128xi32> to vector<32x128xf32>
      %194 = vector.broadcast %23 : vector<1x128xf32> to vector<32x128xf32>
      %195 = arith.mulf %193, %194 : vector<32x128xf32>
      %196 = arith.truncf %195 : vector<32x128xf32> to vector<32x128xbf16>
      %cst_65 = arith.constant dense<0.000000e+00> : vector<16x128xf32>
      %197 = tpu.matmul %176, %192, %cst_65 {dimension_numbers = #tpu.dot_dimension_numbers<[1], [0], [0], [1], [0, 0, 1, 1], [], []>} : vector<16x32xbf16>, vector<32x128xbf16>, vector<16x128xf32> -> vector<16x128xf32>
      %198 = arith.addf %173, %197 : vector<16x128xf32>
      %cst_66 = arith.constant dense<0.000000e+00> : vector<16x128xf32>
      %199 = tpu.matmul %176, %196, %cst_66 {dimension_numbers = #tpu.dot_dimension_numbers<[1], [0], [0], [1], [0, 0, 1, 1], [], []>} : vector<16x32xbf16>, vector<32x128xbf16>, vector<16x128xf32> -> vector<16x128xf32>
      %200 = arith.addf %175, %199 : vector<16x128xf32>
      %201 = vector.extract_strided_slice %15 {offsets = [0, 224], sizes = [16, 32], strides = [1, 1]} : vector<16x256xbf16> to vector<16x32xbf16>
      %c28_i32 = arith.constant 28 : i32
      %202 = vector.broadcast %c28_i32 : i32 to vector<32x128xi32>
      %203 = arith.shrsi %17, %202 : vector<32x128xi32>
      %c15_i32_67 = arith.constant 15 : i32
      %204 = vector.broadcast %c15_i32_67 : i32 to vector<32x128xi32>
      %205 = arith.andi %203, %204 : vector<32x128xi32>
      %c8_i32_68 = arith.constant 8 : i32
      %206 = vector.broadcast %c8_i32_68 : i32 to vector<32x128xi32>
      %207 = arith.subi %205, %206 : vector<32x128xi32>
      %c28_i32_69 = arith.constant 28 : i32
      %208 = vector.broadcast %c28_i32_69 : i32 to vector<32x128xi32>
      %209 = arith.shrsi %19, %208 : vector<32x128xi32>
      %c15_i32_70 = arith.constant 15 : i32
      %210 = vector.broadcast %c15_i32_70 : i32 to vector<32x128xi32>
      %211 = arith.andi %209, %210 : vector<32x128xi32>
      %c8_i32_71 = arith.constant 8 : i32
      %212 = vector.broadcast %c8_i32_71 : i32 to vector<32x128xi32>
      %213 = arith.subi %211, %212 : vector<32x128xi32>
      %214 = arith.sitofp %207 : vector<32x128xi32> to vector<32x128xf32>
      %215 = vector.broadcast %21 : vector<1x128xf32> to vector<32x128xf32>
      %216 = arith.mulf %214, %215 : vector<32x128xf32>
      %217 = arith.truncf %216 : vector<32x128xf32> to vector<32x128xbf16>
      %218 = arith.sitofp %213 : vector<32x128xi32> to vector<32x128xf32>
      %219 = vector.broadcast %23 : vector<1x128xf32> to vector<32x128xf32>
      %220 = arith.mulf %218, %219 : vector<32x128xf32>
      %221 = arith.truncf %220 : vector<32x128xf32> to vector<32x128xbf16>
      %cst_72 = arith.constant dense<0.000000e+00> : vector<16x128xf32>
      %222 = tpu.matmul %201, %217, %cst_72 {dimension_numbers = #tpu.dot_dimension_numbers<[1], [0], [0], [1], [0, 0, 1, 1], [], []>} : vector<16x32xbf16>, vector<32x128xbf16>, vector<16x128xf32> -> vector<16x128xf32>
      %223 = arith.addf %198, %222 : vector<16x128xf32>
      %cst_73 = arith.constant dense<0.000000e+00> : vector<16x128xf32>
      %224 = tpu.matmul %201, %221, %cst_73 {dimension_numbers = #tpu.dot_dimension_numbers<[1], [0], [0], [1], [0, 0, 1, 1], [], []>} : vector<16x32xbf16>, vector<32x128xbf16>, vector<16x128xf32> -> vector<16x128xf32>
      %225 = arith.addf %200, %224 : vector<16x128xf32>
      %226 = arith.negf %223 : vector<16x128xf32>
      %227 = math.exp %226 : vector<16x128xf32>
      %cst_74 = arith.constant 1.000000e+00 : f32
      %228 = vector.broadcast %cst_74 : f32 to vector<16x128xf32>
      %229 = arith.addf %228, %227 : vector<16x128xf32>
      %230 = arith.divf %228, %229 : vector<16x128xf32>
      %231 = arith.mulf %223, %230 : vector<16x128xf32>
      %232 = arith.mulf %231, %225 : vector<16x128xf32>
      %c0_75 = arith.constant 0 : index
      %c0_76 = arith.constant 0 : index
      %c0_77 = arith.constant 0 : index
      %233 = vector.load %arg13[%c0_75, %c0_76, %c0_77] : memref<1x16x1xf32, #tpu.memory_space<vmem>>, vector<1x16x1xf32>
      %234 = vector.shape_cast %233 : vector<1x16x1xf32> to vector<16x1xf32>
      %235 = vector.broadcast %234 : vector<16x1xf32> to vector<16x128xf32>
      %236 = arith.mulf %232, %235 : vector<16x128xf32>
      %237 = arith.truncf %236 : vector<16x128xf32> to vector<16x128xbf16>
      %c0_78 = arith.constant 0 : index
      %c0_79 = arith.constant 0 : index
      %c0_80 = arith.constant 0 : index
      %238 = vector.load %arg11[%c0_78, %c0_79, %c0_80] : memref<1x16x256xi32, #tpu.memory_space<vmem>>, vector<1x16x256xi32>
      %239 = vector.shape_cast %238 : vector<1x16x256xi32> to vector<16x256xi32>
      %c0_81 = arith.constant 0 : index
      %c0_82 = arith.constant 0 : index
      %c0_83 = arith.constant 0 : index
      %240 = vector.load %arg12[%c0_81, %c0_82, %c0_83] : memref<1x1x256xf32, #tpu.memory_space<vmem>>, vector<1x1x256xf32>
      %241 = vector.shape_cast %240 : vector<1x1x256xf32> to vector<1x256xf32>
      %cst_84 = arith.constant 0.000000e+00 : f32
      %242 = vector.broadcast %cst_84 : f32 to vector<16x256xf32>
      %243 = vector.extract_strided_slice %237 {offsets = [0, 0], sizes = [16, 16], strides = [1, 1]} : vector<16x128xbf16> to vector<16x16xbf16>
      %c0_i32_85 = arith.constant 0 : i32
      %244 = vector.broadcast %c0_i32_85 : i32 to vector<16x256xi32>
      %245 = arith.shrsi %239, %244 : vector<16x256xi32>
      %c15_i32_86 = arith.constant 15 : i32
      %246 = vector.broadcast %c15_i32_86 : i32 to vector<16x256xi32>
      %247 = arith.andi %245, %246 : vector<16x256xi32>
      %c8_i32_87 = arith.constant 8 : i32
      %248 = vector.broadcast %c8_i32_87 : i32 to vector<16x256xi32>
      %249 = arith.subi %247, %248 : vector<16x256xi32>
      %250 = arith.sitofp %249 : vector<16x256xi32> to vector<16x256xf32>
      %251 = vector.broadcast %241 : vector<1x256xf32> to vector<16x256xf32>
      %252 = arith.mulf %250, %251 : vector<16x256xf32>
      %253 = arith.truncf %252 : vector<16x256xf32> to vector<16x256xbf16>
      %cst_88 = arith.constant dense<0.000000e+00> : vector<16x256xf32>
      %254 = tpu.matmul %243, %253, %cst_88 {dimension_numbers = #tpu.dot_dimension_numbers<[1], [0], [0], [1], [0, 0, 1, 1], [], []>} : vector<16x16xbf16>, vector<16x256xbf16>, vector<16x256xf32> -> vector<16x256xf32>
      %255 = arith.addf %242, %254 : vector<16x256xf32>
      %256 = vector.extract_strided_slice %237 {offsets = [0, 16], sizes = [16, 16], strides = [1, 1]} : vector<16x128xbf16> to vector<16x16xbf16>
      %c4_i32_89 = arith.constant 4 : i32
      %257 = vector.broadcast %c4_i32_89 : i32 to vector<16x256xi32>
      %258 = arith.shrsi %239, %257 : vector<16x256xi32>
      %c15_i32_90 = arith.constant 15 : i32
      %259 = vector.broadcast %c15_i32_90 : i32 to vector<16x256xi32>
      %260 = arith.andi %258, %259 : vector<16x256xi32>
      %c8_i32_91 = arith.constant 8 : i32
      %261 = vector.broadcast %c8_i32_91 : i32 to vector<16x256xi32>
      %262 = arith.subi %260, %261 : vector<16x256xi32>
      %263 = arith.sitofp %262 : vector<16x256xi32> to vector<16x256xf32>
      %264 = vector.broadcast %241 : vector<1x256xf32> to vector<16x256xf32>
      %265 = arith.mulf %263, %264 : vector<16x256xf32>
      %266 = arith.truncf %265 : vector<16x256xf32> to vector<16x256xbf16>
      %cst_92 = arith.constant dense<0.000000e+00> : vector<16x256xf32>
      %267 = tpu.matmul %256, %266, %cst_92 {dimension_numbers = #tpu.dot_dimension_numbers<[1], [0], [0], [1], [0, 0, 1, 1], [], []>} : vector<16x16xbf16>, vector<16x256xbf16>, vector<16x256xf32> -> vector<16x256xf32>
      %268 = arith.addf %255, %267 : vector<16x256xf32>
      %269 = vector.extract_strided_slice %237 {offsets = [0, 32], sizes = [16, 16], strides = [1, 1]} : vector<16x128xbf16> to vector<16x16xbf16>
      %c8_i32_93 = arith.constant 8 : i32
      %270 = vector.broadcast %c8_i32_93 : i32 to vector<16x256xi32>
      %271 = arith.shrsi %239, %270 : vector<16x256xi32>
      %c15_i32_94 = arith.constant 15 : i32
      %272 = vector.broadcast %c15_i32_94 : i32 to vector<16x256xi32>
      %273 = arith.andi %271, %272 : vector<16x256xi32>
      %c8_i32_95 = arith.constant 8 : i32
      %274 = vector.broadcast %c8_i32_95 : i32 to vector<16x256xi32>
      %275 = arith.subi %273, %274 : vector<16x256xi32>
      %276 = arith.sitofp %275 : vector<16x256xi32> to vector<16x256xf32>
      %277 = vector.broadcast %241 : vector<1x256xf32> to vector<16x256xf32>
      %278 = arith.mulf %276, %277 : vector<16x256xf32>
      %279 = arith.truncf %278 : vector<16x256xf32> to vector<16x256xbf16>
      %cst_96 = arith.constant dense<0.000000e+00> : vector<16x256xf32>
      %280 = tpu.matmul %269, %279, %cst_96 {dimension_numbers = #tpu.dot_dimension_numbers<[1], [0], [0], [1], [0, 0, 1, 1], [], []>} : vector<16x16xbf16>, vector<16x256xbf16>, vector<16x256xf32> -> vector<16x256xf32>
      %281 = arith.addf %268, %280 : vector<16x256xf32>
      %282 = vector.extract_strided_slice %237 {offsets = [0, 48], sizes = [16, 16], strides = [1, 1]} : vector<16x128xbf16> to vector<16x16xbf16>
      %c12_i32_97 = arith.constant 12 : i32
      %283 = vector.broadcast %c12_i32_97 : i32 to vector<16x256xi32>
      %284 = arith.shrsi %239, %283 : vector<16x256xi32>
      %c15_i32_98 = arith.constant 15 : i32
      %285 = vector.broadcast %c15_i32_98 : i32 to vector<16x256xi32>
      %286 = arith.andi %284, %285 : vector<16x256xi32>
      %c8_i32_99 = arith.constant 8 : i32
      %287 = vector.broadcast %c8_i32_99 : i32 to vector<16x256xi32>
      %288 = arith.subi %286, %287 : vector<16x256xi32>
      %289 = arith.sitofp %288 : vector<16x256xi32> to vector<16x256xf32>
      %290 = vector.broadcast %241 : vector<1x256xf32> to vector<16x256xf32>
      %291 = arith.mulf %289, %290 : vector<16x256xf32>
      %292 = arith.truncf %291 : vector<16x256xf32> to vector<16x256xbf16>
      %cst_100 = arith.constant dense<0.000000e+00> : vector<16x256xf32>
      %293 = tpu.matmul %282, %292, %cst_100 {dimension_numbers = #tpu.dot_dimension_numbers<[1], [0], [0], [1], [0, 0, 1, 1], [], []>} : vector<16x16xbf16>, vector<16x256xbf16>, vector<16x256xf32> -> vector<16x256xf32>
      %294 = arith.addf %281, %293 : vector<16x256xf32>
      %295 = vector.extract_strided_slice %237 {offsets = [0, 64], sizes = [16, 16], strides = [1, 1]} : vector<16x128xbf16> to vector<16x16xbf16>
      %c16_i32_101 = arith.constant 16 : i32
      %296 = vector.broadcast %c16_i32_101 : i32 to vector<16x256xi32>
      %297 = arith.shrsi %239, %296 : vector<16x256xi32>
      %c15_i32_102 = arith.constant 15 : i32
      %298 = vector.broadcast %c15_i32_102 : i32 to vector<16x256xi32>
      %299 = arith.andi %297, %298 : vector<16x256xi32>
      %c8_i32_103 = arith.constant 8 : i32
      %300 = vector.broadcast %c8_i32_103 : i32 to vector<16x256xi32>
      %301 = arith.subi %299, %300 : vector<16x256xi32>
      %302 = arith.sitofp %301 : vector<16x256xi32> to vector<16x256xf32>
      %303 = vector.broadcast %241 : vector<1x256xf32> to vector<16x256xf32>
      %304 = arith.mulf %302, %303 : vector<16x256xf32>
      %305 = arith.truncf %304 : vector<16x256xf32> to vector<16x256xbf16>
      %cst_104 = arith.constant dense<0.000000e+00> : vector<16x256xf32>
      %306 = tpu.matmul %295, %305, %cst_104 {dimension_numbers = #tpu.dot_dimension_numbers<[1], [0], [0], [1], [0, 0, 1, 1], [], []>} : vector<16x16xbf16>, vector<16x256xbf16>, vector<16x256xf32> -> vector<16x256xf32>
      %307 = arith.addf %294, %306 : vector<16x256xf32>
      %308 = vector.extract_strided_slice %237 {offsets = [0, 80], sizes = [16, 16], strides = [1, 1]} : vector<16x128xbf16> to vector<16x16xbf16>
      %c20_i32_105 = arith.constant 20 : i32
      %309 = vector.broadcast %c20_i32_105 : i32 to vector<16x256xi32>
      %310 = arith.shrsi %239, %309 : vector<16x256xi32>
      %c15_i32_106 = arith.constant 15 : i32
      %311 = vector.broadcast %c15_i32_106 : i32 to vector<16x256xi32>
      %312 = arith.andi %310, %311 : vector<16x256xi32>
      %c8_i32_107 = arith.constant 8 : i32
      %313 = vector.broadcast %c8_i32_107 : i32 to vector<16x256xi32>
      %314 = arith.subi %312, %313 : vector<16x256xi32>
      %315 = arith.sitofp %314 : vector<16x256xi32> to vector<16x256xf32>
      %316 = vector.broadcast %241 : vector<1x256xf32> to vector<16x256xf32>
      %317 = arith.mulf %315, %316 : vector<16x256xf32>
      %318 = arith.truncf %317 : vector<16x256xf32> to vector<16x256xbf16>
      %cst_108 = arith.constant dense<0.000000e+00> : vector<16x256xf32>
      %319 = tpu.matmul %308, %318, %cst_108 {dimension_numbers = #tpu.dot_dimension_numbers<[1], [0], [0], [1], [0, 0, 1, 1], [], []>} : vector<16x16xbf16>, vector<16x256xbf16>, vector<16x256xf32> -> vector<16x256xf32>
      %320 = arith.addf %307, %319 : vector<16x256xf32>
      %321 = vector.extract_strided_slice %237 {offsets = [0, 96], sizes = [16, 16], strides = [1, 1]} : vector<16x128xbf16> to vector<16x16xbf16>
      %c24_i32_109 = arith.constant 24 : i32
      %322 = vector.broadcast %c24_i32_109 : i32 to vector<16x256xi32>
      %323 = arith.shrsi %239, %322 : vector<16x256xi32>
      %c15_i32_110 = arith.constant 15 : i32
      %324 = vector.broadcast %c15_i32_110 : i32 to vector<16x256xi32>
      %325 = arith.andi %323, %324 : vector<16x256xi32>
      %c8_i32_111 = arith.constant 8 : i32
      %326 = vector.broadcast %c8_i32_111 : i32 to vector<16x256xi32>
      %327 = arith.subi %325, %326 : vector<16x256xi32>
      %328 = arith.sitofp %327 : vector<16x256xi32> to vector<16x256xf32>
      %329 = vector.broadcast %241 : vector<1x256xf32> to vector<16x256xf32>
      %330 = arith.mulf %328, %329 : vector<16x256xf32>
      %331 = arith.truncf %330 : vector<16x256xf32> to vector<16x256xbf16>
      %cst_112 = arith.constant dense<0.000000e+00> : vector<16x256xf32>
      %332 = tpu.matmul %321, %331, %cst_112 {dimension_numbers = #tpu.dot_dimension_numbers<[1], [0], [0], [1], [0, 0, 1, 1], [], []>} : vector<16x16xbf16>, vector<16x256xbf16>, vector<16x256xf32> -> vector<16x256xf32>
      %333 = arith.addf %320, %332 : vector<16x256xf32>
      %334 = vector.extract_strided_slice %237 {offsets = [0, 112], sizes = [16, 16], strides = [1, 1]} : vector<16x128xbf16> to vector<16x16xbf16>
      %c28_i32_113 = arith.constant 28 : i32
      %335 = vector.broadcast %c28_i32_113 : i32 to vector<16x256xi32>
      %336 = arith.shrsi %239, %335 : vector<16x256xi32>
      %c15_i32_114 = arith.constant 15 : i32
      %337 = vector.broadcast %c15_i32_114 : i32 to vector<16x256xi32>
      %338 = arith.andi %336, %337 : vector<16x256xi32>
      %c8_i32_115 = arith.constant 8 : i32
      %339 = vector.broadcast %c8_i32_115 : i32 to vector<16x256xi32>
      %340 = arith.subi %338, %339 : vector<16x256xi32>
      %341 = arith.sitofp %340 : vector<16x256xi32> to vector<16x256xf32>
      %342 = vector.broadcast %241 : vector<1x256xf32> to vector<16x256xf32>
      %343 = arith.mulf %341, %342 : vector<16x256xf32>
      %344 = arith.truncf %343 : vector<16x256xf32> to vector<16x256xbf16>
      %cst_116 = arith.constant dense<0.000000e+00> : vector<16x256xf32>
      %345 = tpu.matmul %334, %344, %cst_116 {dimension_numbers = #tpu.dot_dimension_numbers<[1], [0], [0], [1], [0, 0, 1, 1], [], []>} : vector<16x16xbf16>, vector<16x256xbf16>, vector<16x256xf32> -> vector<16x256xf32>
      %346 = arith.addf %333, %345 : vector<16x256xf32>
      %c0_117 = arith.constant 0 : index
      %c0_118 = arith.constant 0 : index
      %347 = vector.load %arg15[%c0_117, %c0_118] : memref<16x256xf32, #tpu.memory_space<vmem>>, vector<16x256xf32>
      %348 = arith.addf %347, %346 : vector<16x256xf32>
      %c0_119 = arith.constant 0 : index
      %c0_120 = arith.constant 0 : index
      %349 = vector.load %arg15[%c0_119, %c0_120] : memref<16x256xf32, #tpu.memory_space<vmem>>, vector<16x256xf32>
      tpu.vector_store %arg15[%c0_119, %c0_120], %348 {strides = array<i32>} : memref<16x256xf32, #tpu.memory_space<vmem>>, vector<16x256xf32>,
    } else {
    }
    %c7_i32 = arith.constant 7 : i32
    %10 = arith.cmpi eq, %arg1, %c7_i32 : i32
    %c2_i32 = arith.constant 2 : i32
    %11 = arith.cmpi eq, %arg2, %c2_i32 : i32
    %12 = arith.andi %10, %11 : i1
    %13 = arith.extui %12 : i1 to i32
    %c0_i32_3 = arith.constant 0 : i32
    %14 = arith.cmpi ne, %13, %c0_i32_3 : i32
    scf.if %14 {
      %c0 = arith.constant 0 : index
      %c0_4 = arith.constant 0 : index
      %15 = vector.load %arg15[%c0, %c0_4] : memref<16x256xf32, #tpu.memory_space<vmem>>, vector<16x256xf32>
      %c0_5 = arith.constant 0 : index
      %c0_6 = arith.constant 0 : index
      %16 = vector.load %arg14[%c0_5, %c0_6] : memref<16x256xf32, #tpu.memory_space<vmem>>, vector<16x256xf32>
      tpu.vector_store %arg14[%c0_5, %c0_6], %15 {strides = array<i32>} : memref<16x256xf32, #tpu.memory_space<vmem>>, vector<16x256xf32>,
    } else {
    }
    return
  }
  func.func @transform_0(%arg0: i32, %arg1: i32, %arg2: i32, %arg3: memref<8xi32, #tpu.memory_space<smem>>, %arg4: memref<8x3xi32, #tpu.memory_space<smem>>, %arg5: memref<8xi32, #tpu.memory_space<smem>>) -> (i32, i32) {
    %c0_i32 = arith.constant 0 : i32
    %c0_i32_0 = arith.constant 0 : i32
    return %arg0, %c0_i32 : i32, i32
  }
  func.func @transform_1(%arg0: i32, %arg1: i32, %arg2: i32, %arg3: memref<8xi32, #tpu.memory_space<smem>>, %arg4: memref<8x3xi32, #tpu.memory_space<smem>>, %arg5: memref<8xi32, #tpu.memory_space<smem>>) -> (i32, i32, i32) {
    %0 = arith.index_cast %arg1 : i32 to index
    %1 = memref.load %arg3[%0] : memref<8xi32, #tpu.memory_space<smem>>
    %2 = arith.index_cast %arg1 : i32 to index
    %3 = arith.index_cast %arg2 : i32 to index
    %4 = memref.load %arg4[%2, %3] : memref<8x3xi32, #tpu.memory_space<smem>>
    %c0_i32 = arith.constant 0 : i32
    %c0_i32_0 = arith.constant 0 : i32
    return %1, %c0_i32, %4 : i32, i32, i32
  }
  func.func @transform_2(%arg0: i32, %arg1: i32, %arg2: i32, %arg3: memref<8xi32, #tpu.memory_space<smem>>, %arg4: memref<8x3xi32, #tpu.memory_space<smem>>, %arg5: memref<8xi32, #tpu.memory_space<smem>>) -> (i32, i32, i32) {
    %0 = arith.index_cast %arg1 : i32 to index
    %1 = memref.load %arg3[%0] : memref<8xi32, #tpu.memory_space<smem>>
    %2 = arith.index_cast %arg1 : i32 to index
    %3 = arith.index_cast %arg2 : i32 to index
    %4 = memref.load %arg4[%2, %3] : memref<8x3xi32, #tpu.memory_space<smem>>
    %c0_i32 = arith.constant 0 : i32
    %c0_i32_0 = arith.constant 0 : i32
    return %1, %c0_i32, %4 : i32, i32, i32
  }
  func.func @transform_3(%arg0: i32, %arg1: i32, %arg2: i32, %arg3: memref<8xi32, #tpu.memory_space<smem>>, %arg4: memref<8x3xi32, #tpu.memory_space<smem>>, %arg5: memref<8xi32, #tpu.memory_space<smem>>) -> (i32, i32, i32) {
    %0 = arith.index_cast %arg1 : i32 to index
    %1 = memref.load %arg3[%0] : memref<8xi32, #tpu.memory_space<smem>>
    %2 = arith.index_cast %arg1 : i32 to index
    %3 = arith.index_cast %arg2 : i32 to index
    %4 = memref.load %arg4[%2, %3] : memref<8x3xi32, #tpu.memory_space<smem>>
    %c0_i32 = arith.constant 0 : i32
    %c0_i32_0 = arith.constant 0 : i32
    return %1, %c0_i32, %4 : i32, i32, i32
  }
  func.func @transform_4(%arg0: i32, %arg1: i32, %arg2: i32, %arg3: memref<8xi32, #tpu.memory_space<smem>>, %arg4: memref<8x3xi32, #tpu.memory_space<smem>>, %arg5: memref<8xi32, #tpu.memory_space<smem>>) -> (i32, i32, i32) {
    %0 = arith.index_cast %arg1 : i32 to index
    %1 = memref.load %arg3[%0] : memref<8xi32, #tpu.memory_space<smem>>
    %2 = arith.index_cast %arg1 : i32 to index
    %3 = arith.index_cast %arg2 : i32 to index
    %4 = memref.load %arg4[%2, %3] : memref<8x3xi32, #tpu.memory_space<smem>>
    %c0_i32 = arith.constant 0 : i32
    %c0_i32_0 = arith.constant 0 : i32
    return %1, %c0_i32, %4 : i32, i32, i32
  }
  func.func @transform_5(%arg0: i32, %arg1: i32, %arg2: i32, %arg3: memref<8xi32, #tpu.memory_space<smem>>, %arg4: memref<8x3xi32, #tpu.memory_space<smem>>, %arg5: memref<8xi32, #tpu.memory_space<smem>>) -> (i32, i32, i32) {
    %0 = arith.index_cast %arg1 : i32 to index
    %1 = memref.load %arg3[%0] : memref<8xi32, #tpu.memory_space<smem>>
    %2 = arith.index_cast %arg1 : i32 to index
    %3 = arith.index_cast %arg2 : i32 to index
    %4 = memref.load %arg4[%2, %3] : memref<8x3xi32, #tpu.memory_space<smem>>
    %c0_i32 = arith.constant 0 : i32
    %c0_i32_0 = arith.constant 0 : i32
    return %1, %4, %c0_i32 : i32, i32, i32
  }
  func.func @transform_6(%arg0: i32, %arg1: i32, %arg2: i32, %arg3: memref<8xi32, #tpu.memory_space<smem>>, %arg4: memref<8x3xi32, #tpu.memory_space<smem>>, %arg5: memref<8xi32, #tpu.memory_space<smem>>) -> (i32, i32, i32) {
    %0 = arith.index_cast %arg1 : i32 to index
    %1 = memref.load %arg3[%0] : memref<8xi32, #tpu.memory_space<smem>>
    %c0_i32 = arith.constant 0 : i32
    %c0_i32_0 = arith.constant 0 : i32
    %c0_i32_1 = arith.constant 0 : i32
    return %1, %c0_i32, %c0_i32_0 : i32, i32, i32
  }
  func.func @transform_7(%arg0: i32, %arg1: i32, %arg2: i32, %arg3: memref<8xi32, #tpu.memory_space<smem>>, %arg4: memref<8x3xi32, #tpu.memory_space<smem>>, %arg5: memref<8xi32, #tpu.memory_space<smem>>) -> (i32, i32, i32) {
    %0 = arith.index_cast %arg1 : i32 to index
    %1 = memref.load %arg3[%0] : memref<8xi32, #tpu.memory_space<smem>>
    %c0_i32 = arith.constant 0 : i32
    %c0_i32_0 = arith.constant 0 : i32
    return %1, %arg0, %c0_i32 : i32, i32, i32
  }
  func.func @transform_8(%arg0: i32, %arg1: i32, %arg2: i32, %arg3: memref<8xi32, #tpu.memory_space<smem>>, %arg4: memref<8x3xi32, #tpu.memory_space<smem>>, %arg5: memref<8xi32, #tpu.memory_space<smem>>) -> (i32, i32) {
    %c0_i32 = arith.constant 0 : i32
    %c0_i32_0 = arith.constant 0 : i32
    return %arg0, %c0_i32 : i32, i32
  }
}

</mosaic_0001>

<bundles_post_ra>
// kernel: _lambda_.1
= control target key start
LH: loop header
LB: loop body
LE: loop exit
PB: predicated region body
PF: predicated region fallthrough
CT: control target
= control target key end

     0   :  { %s4579_s0 = inlined_call_operand.vmem [shape: s32[8], index: 0, kind: input, shape index: {}]   ;;  %s4580_s3 = inlined_call_operand.vmem [shape: bf16[48,256], index: 3, kind: input, shape index: {}]   ;;  %s4581_s4 = inlined_call_operand.vmem [shape: s32[8,32,384], index: 4, kind: input, shape index: {}]   ;;  %s4582_s5 = inlined_call_operand.vmem [shape: f32[8,1,384], index: 5, kind: input, shape index: {}]   ;;  %s4583_s6 = inlined_call_operand.vmem [shape: s32[8,32,384], index: 6, kind: input, shape index: {}]   ;;  %s4584_s7 = inlined_call_operand.vmem [shape: f32[8,1,384], index: 7, kind: input, shape index: {}]   ;;  %s4585_s8 = inlined_call_operand.vmem [shape: s32[8,48,256], index: 8, kind: input, shape index: {}]   ;;  %s4586_s9 = inlined_call_operand.vmem [shape: f32[8,1,256], index: 9, kind: input, shape index: {}]   ;;  %s4587_s10 = inlined_call_operand.vmem [shape: f32[8,48,1], index: 10, kind: input, shape index: {}]   ;;  %s4588_s11 = inlined_call_operand.hbm [shape: f32[48,256], index: 11, kind: output, shape index: {}]   ;;  %s4589_s1 = inlined_call_operand.vmem [shape: s32[8,3], index: 1, kind: input, shape index: {}]   ;;  %s4590_s2 = inlined_call_operand.vmem [shape: s32[8], index: 2, kind: input, shape index: {}]  }
   0x1   :  { %4607 = sst [smem:[#allocation31_spill]] %s4580_s3  ;;  %s16_s19 = sshll.u32 %s4579_s0, 4  ;;  %s17_s19 = int_to_ptr.vmem [resolvable:$true] %s16_s19 }
   0x2   :  { %4608 = sst [smem:[#allocation32_spill]] %s4581_s4  ;;  %s20_s22 = sshll.u32 %s4589_s1, 4  ;;  %s21_s22 = int_to_ptr.vmem [resolvable:$true] %s20_s22 }
   0x3   :  { %4609 = sst [smem:[#allocation33_spill]] %s4582_s5  ;;  %s3482_s23 = scalar_lea.vmem %s17_s19, 16 }
   0x4   :  { %4610 = sst [smem:[#allocation34_spill]] %s4583_s6  ;;  %p3483_p0 = scmp.ne.s32.totalorder %s17_s19, %s3482_s23 }
   0x5   :  { %4611 = sst [smem:[#allocation35_spill]] %s4584_s7  ;;  %p3487_p1 = scmp.lt.s32.totalorder %s17_s19, %s17_s19 }
   0x6   :  { %4612 = sst [smem:[#allocation36_spill]] %s4585_s8  ;;  %p3488_p2 = scmp.lt.s32.totalorder %s3482_s23, %s3482_s23 }
   0x7   :  { %4613 = sst [smem:[#allocation37_spill]] %s4586_s9 }
   0x8   :  { %4614 = sst [smem:[#allocation38_spill]] %s4587_s10  ;;  %p3489_p3 = por %p3488_p2, %p3487_p1 }
   0x9   :  { %4615 = sst [smem:[#allocation39_spill]] %s4588_s11 }
   0xa   :  { %p3490_p4 = pnand %p3489_p3, %p3483_p0 }
   0xc   :  { %3493 = shalt.err (!%p3490_p4)  }
   0xd   :  { %s3664_s24 = smov [#allocation4]   ;;  %s3494_s25 = scalar_lea.vmem %s21_s22, 128 }
   0xe   :  { %19 = dma.vmem_to_smem %s17_s19, 16, %s3664_s24, [#allocation3] }
   0xf   :  { %p3495_p5 = scmp.ne.s32.totalorder %s21_s22, %s3494_s25  ;;  %p3499_p6 = scmp.lt.s32.totalorder %s21_s22, %s21_s22 }
  0x10   :  { %p3500_p7 = scmp.lt.s32.totalorder %s3494_s25, %s3494_s25 }
  0x12   :  { %p3501_p8 = por %p3500_p7, %p3499_p6 }
  0x14   :  { %p3502_p9 = pnand %p3501_p8, %p3495_p5 }
  0x16   :  { %3505 = shalt.err (!%p3502_p9)  }
  0x17   :  { %s3665_s0 = smov [#allocation5]   ;;  %s24_s27 = sshll.u32 %s4590_s2, 4  ;;  %s25_s27 = int_to_ptr.vmem [resolvable:$true] %s24_s27 }
  0x18   :  { %23 = dma.vmem_to_smem %s21_s22, 128, %s3665_s0, [#allocation3] }
  0x19   :  { %s3506_s28 = scalar_lea.vmem %s25_s27, 16  ;;  %p3511_p11 = scmp.lt.s32.totalorder %s25_s27, %s25_s27 }
  0x1a   :  { %p3507_p10 = scmp.ne.s32.totalorder %s25_s27, %s3506_s28  ;;  %p3512_p12 = scmp.lt.s32.totalorder %s3506_s28, %s3506_s28 }
  0x1c   :  { %p3513_p13 = por %p3512_p12, %p3511_p11 }
  0x1e   :  { %p3514_p0 = pnand %p3513_p13, %p3507_p10 }
  0x20   :  { %3517 = shalt.err (!%p3514_p0)  }
  0x21   :  { %s3666_s29 = smov [#allocation6]  }
  0x22   :  { %27 = dma.vmem_to_smem %s25_s27, 16, %s3666_s29, [#allocation3] }
  0x23   :  { %3602 = dma.done.wait [#allocation3], 160 }
  0x24   :  { %3603 = vsyncadd [#allocation3], 4294967136 }
  0x25   :  { %29 = sfence }
  0x26   :  { %30 = vsyncpa [#allocation10], 0 }
  0x27   :  { %32 = vsyncpa [#allocation10 + $0x1], 0  ;;  %s3750_s30 = smov 0   ;;  %s3752_s12 = smov 0  }
  0x28   :  { %s3754_s2 = smov 0   ;;  %s3756_s13 = smov 0  }
  0x29   :  { %s3758_s14 = smov 0   ;;  %s3760_s15 = smov 0  }
  0x2a   :  { %s3762_s16 = smov 0   ;;  %s3764_s17 = smov 0  }
  0x2b   :  { %s3766_s18 = smov 0   ;;  %s3768_s19 = smov 0  }
  0x2c   :  { %s3770_s20 = smov 0   ;;  %s3772_s21 = smov 0  }
  0x2d   :  { %s3774_s22 = smov 0   ;;  %s3776_s23 = smov 0  }
  0x2e LB: > { %4616 = sst [smem:[#allocation13_spill]] %s3610_s30  ;;  %s50_s0 = sadd.s32 1, %s3650_s20  ;;  %s3662_s23 = sphi %s3776_s23, %s38_s23   ;;  %s3658_s22 = sphi %s3774_s22, %s4679_s22   ;;  %s3654_s21 = sphi %s3772_s21, %s4678_s21   ;;  %s3650_s20 = sphi %s3770_s20, %s4677_s20   ;;  %s3646_s19 = sphi %s3768_s19, %s4676_s19   ;;  %s3642_s18 = sphi %s3766_s18, %s4675_s18   ;;  %s3638_s17 = sphi %s3764_s17, %s4684_s17   ;;  %s3634_s16 = sphi %s3762_s16, %s4673_s16   ;;  %s3630_s15 = sphi %s3760_s15, %s4672_s15   ;;  %s3626_s14 = sphi %s3758_s14, %s4671_s14   ;;  %s3622_s13 = sphi %s3756_s13, %s4683_s13   ;;  %s3618_s2 = sphi %s3754_s2, %s4669_s2   ;;  %s3614_s12 = sphi %s3752_s12, %s4682_s12   ;;  %s3610_s30 = sphi %s3750_s30, %s4681_s30  }
  0x2f   : > { %4617 = sst [smem:[#allocation14_spill]] %s3618_s2  ;;  %s53_s1 = sadd.s32 1, %s3654_s21 }
  0x30   : > { %4618 = sst [smem:[#allocation15_spill]] %s3622_s13  ;;  %p51_p1 = scmp.ge.s32.totalorder %s50_s0, 3 }
  0x31   : > { %4619 = sst [smem:[#allocation16_spill]] %s3626_s14  ;;  %s57_s26 = sadd.s32 1, %s3658_s22 }
  0x32   : > { %4620 = sst [smem:[#allocation17_spill]] %s3634_s16  ;;  %s88_s28 = sshra.s32 %s3650_s20, 7 }
  0x33   : > { %4621 = sst [smem:[#allocation18_spill]] %s3638_s17  ;;  %s4686_s0 = smov (%p51_p1, %s50_s0), 0 }
  0x34   : > { %4622 = sst [smem:[#allocation19_spill]] %s3642_s18  ;;  %s4688_s1 = smov (!%p51_p1, %s53_s1), %s3654_s21 }
  0x35   : > { %4623 = sst [smem:[#allocation20_spill]] %s3646_s19  ;;  %s90_s29 = sadd.s32 %s3654_s21, %s88_s28 }
  0x36   : > { %4624 = sst [smem:[#allocation21_spill]] %s3650_s20  ;;  %s93_s11 = sand.u32 127, %s3650_s20 }
  0x37   : > { %4625 = sst [smem:[#allocation22_spill]] %s3654_s21  ;;  %p55_p2 = scmp.ge.s32.totalorder %s4688_s1, 8 }
  0x38   : > { %4626 = sst [smem:[#allocation23_spill]] %s3658_s22  ;;  %s2888_s25 = sshll.u32 %s90_s29, 7 }
  0x39   : > { %s3826_s27 = sld [smem:[#allocation4 + %s3654_s21]]  ;;  %s3834_s24 = sadd.s32 %s2888_s25, %s93_s11 }
  0x3a   : > { %4627 = sst [smem:[#allocation24_spill]] %s4686_s0  ;;  %s97_s10 = sshra.s32 %s4686_s0, 7 }
  0x3b   : > { %s4690_s1 = smov (%p55_p2, %s4688_s1), 0  ;;  %s4692_s26 = smov (!%p55_p2, %s57_s26), %s3658_s22 }
  0x3c   : > { %4628 = sst [smem:[#allocation25_spill]] %s4690_s1  ;;  %p59_p3 = scmp.ge.s32.totalorder %s4692_s26, 3 }
  0x3d   : > { %s95_s28 = sld [smem:[#allocation5 + %s3834_s24]]  ;;  %s99_s9 = sadd.s32 %s97_s10, %s4690_s1 }
  0x3e   : > { %s96_s20 = sld [smem:[#allocation4 + %s4690_s1]]  ;;  %s2889_s11 = sshll.u32 %s99_s9, 7 }
  0x3f   : > { %s102_s25 = sand.u32 127, %s4686_s0  ;;  %s4694_s26 = smov (%p59_p3, %s4692_s26), 0 }
  0x40   : > { %4629 = sst [smem:[#allocation26_spill]] %s4694_s26  ;;  %s103_s29 = sadd.s32 %s2889_s11, %s102_s25 }
  0x41   : > { %s110_s8 = sadd.s32 1, %s3634_s16  ;;  %s104_s7 = sld [smem:[#allocation5 + %s103_s29]] }
  0x42   : > { %p117_p4 = scmp.ne.s32.totalorder %s3634_s16, %s3630_s15  ;;  %p118_p5 = scmp.eq.s32.totalorder %s3662_s23, 0 }
  0x43   : > { %s179_s3 = sld [smem:[#allocation4 + %s3654_s21]]  ;;  %s202_s11 = sadd.s32 1, %s3626_s14 }
  0x44   : > { %s105_s5 = ssub.s32 %s3826_s27, %s96_s20  ;;  %s187_s10 = sld [smem:[#allocation5 + %s3834_s24]] }
  0x45   : > { %p3853_p6 = por %p118_p5, %p117_p4  ;;  %s188_s9 = sld [smem:[#allocation4 + %s4690_s1]] }
  0x46   : > { %s196_s0 = sld [smem:[#allocation5 + %s103_s29]]  ;;  %p209_p7 = scmp.ne.s32.totalorder %s3626_s14, %s3622_s13 }
  0x47   : > { %s375_s25 = ssub.s32 %s3658_s22, %s4694_s26  ;;  %s106_s20 = ssub.s32 %s95_s28, %s104_s7 }
  0x48   : > { %p3863_p8 = scmp.eq.s32.totalorder %s375_s25, 0  ;;  %s107_s18 = sor.u32 %s106_s20, %s105_s5 }
  0x49   : > { %p3867_p9 = por %p209_p7, %p118_p5  ;;  %p108_p10 = scmp.eq.s32.totalorder %s107_s18, 0 }
  0x4a   : > { %s378_s29 = sadd.s32 1, %s3618_s2  ;;  %p388_p11 = scmp.ne.s32.totalorder %s3618_s2, %s3614_s12 }
  0x4b   : > { %s197_s1 = ssub.s32 %s179_s3, %s188_s9  ;;  %s4634_s7 = sadd.s32 4294967295, %s3662_s23  }
  0x4c   : > { %s3875_s13 = scalar_select %p108_p10, %s3634_s16, %s110_s8  }
  0x4d   : > { %s198_s26 = ssub.s32 %s187_s10, %s196_s0  ;;  %p389_p12 = scmp.eq.s32.totalorder %s4634_s7, 71 }
  0x4e   : > { %4633 = sst [smem:[#allocation27_spill]] %s3875_s13  ;;  %s199_s28 = sor.u32 %s198_s26, %s197_s1 }
  0x4f   : > { %p394_p13 = scmp.ne.s32.totalorder %s3614_s12, %s3610_s30  ;;  %p200_p0 = scmp.eq.s32.totalorder %s199_s28, 0 }
  0x50   : > { %p3881_p1 = por %p389_p12, %p388_p11  ;;  %s4638_s18 = sadd.s32 4294967294, %s3662_s23  }
  0x51   : > { %s3888_s5 = scalar_select %p3863_p8, %s3618_s2, %s378_s29  }
  0x52   : > { %s3891_s20 = scalar_select %p200_p0, %s3626_s14, %s202_s11  }
  0x53   : > { %4636 = sst [smem:[#allocation28_spill]] %s3888_s5  ;;  %p395_p2 = scmp.eq.s32.totalorder %s4638_s18, 71 }
  0x54   : > { %4637 = sst [smem:[#allocation29_spill]] %s3891_s20  ;;  %p2899_p4 = scmp.ge.s32.totalorder %s3662_s23, 72 }
  0x55   : > { %p3895_p3 = por %p395_p2, %p394_p13 }
  0x56   : > { %411 = sbr.rel (%p2899_p4) target bundleno = 121 (0x79), region = 16 }
  0x57   : > { %s4639_s3 = scalar_select %p3895_p3, 1, 0 }
  0x59   : > { %4640 = sst [smem:[#allocation30_spill]] %s4639_s3 }
  0x5d   : > { %424 = sbr.rel (!%p3853_p6) target bundleno = 107 (0x6b), region = 24  ;;  %s429_s8 = sld [smem:[#allocation4 + %s3654_s21]] (%p3853_p6) }
  0x5e   : > { %s437_s0 = sld [smem:[#allocation5 + %s3834_s24]] (%p3853_p6)  ;;  %s426_s1 = sand.u32 (%p3853_p6), 1, %s3634_s16  }
  0x5f   : > { %s2900_s26 = sshll.u32 (%p3853_p6), %s426_s1, 5  ;;  %s4641_s4 = sld [smem:[#allocation32_spill]] (%p3853_p6) }
  0x60   : > { %s428_s28 = scalar_lea.vmem (%p3853_p6), [#allocation7], %s2900_s26 }
  0x63   : > { %s3328_s10 = smul.u32 (%p3853_p6), 12, %s429_s8 }
  0x65   : > { %s439_s9 = sadd.s32 %s3328_s10, %s437_s0 }
  0x66   : > { %s2902_s11 = sshll.u32 %s439_s9, 3 }
  0x67   : > { %s441_s7 = scalar_lea.vmem %s4641_s4, %s2902_s11 }
  0x68   : > { %v475_v0 = vld [vmem:[%s441_s7] sm:$0xff]  ;;  %v477_v1 = vld [vmem:[%s441_s7 + $0x18] sm:$0xff]  ;;  %v479_v2 = vld [vmem:[%s441_s7 + $0x30] sm:$0xff] }
  0x69   : > { %476 = vst [vmem:[%s428_s28] sm:$0xff] %v475_v0  ;;  %478 = vst [vmem:[%s428_s28 + $0x8] sm:$0xff] %v477_v1  ;;  %v481_v3 = vld [vmem:[%s441_s7 + $0x48] sm:$0xff] }
  0x6a   : > { %480 = vst [vmem:[%s428_s28 + $0x10] sm:$0xff] %v479_v2  ;;  %482 = vst [vmem:[%s428_s28 + $0x18] sm:$0xff] %v481_v3 }
  0x6b PF: > { %516 = sbr.rel (!%p3867_p9) target bundleno = 121 (0x79), region = 66  ;;  %s521_s17 = sld [smem:[#allocation4 + %s3654_s21]] (%p3867_p9) }
  0x6c   : > { %s529_s18 = sld [smem:[#allocation5 + %s3834_s24]] (%p3867_p9)  ;;  %s518_s8 = sand.u32 (%p3867_p9), 1, %s3626_s14  }
  0x6d   : > { %s2903_s0 = sshll.u32 (%p3867_p9), %s518_s8, 5  ;;  %s4642_s6 = sld [smem:[#allocation34_spill]] (%p3867_p9) }
  0x6e   : > { %s520_s29 = scalar_lea.vmem (%p3867_p9), [#allocation8], %s2903_s0 }
  0x71   : > { %s3329_s1 = smul.u32 (%p3867_p9), 12, %s521_s17 }
  0x73   : > { %s531_s10 = sadd.s32 %s3329_s1, %s529_s18 }
  0x74   : > { %s2905_s9 = sshll.u32 %s531_s10, 3 }
  0x75   : > { %s533_s27 = scalar_lea.vmem %s4642_s6, %s2905_s9 }
  0x76   : > { %v567_v4 = vld [vmem:[%s533_s27] sm:$0xff]  ;;  %v569_v5 = vld [vmem:[%s533_s27 + $0x18] sm:$0xff]  ;;  %v571_v6 = vld [vmem:[%s533_s27 + $0x30] sm:$0xff] }
  0x77   : > { %568 = vst [vmem:[%s520_s29] sm:$0xff] %v567_v4  ;;  %570 = vst [vmem:[%s520_s29 + $0x8] sm:$0xff] %v569_v5  ;;  %v573_v7 = vld [vmem:[%s533_s27 + $0x48] sm:$0xff] }
  0x78   : > { %572 = vst [vmem:[%s520_s29 + $0x10] sm:$0xff] %v571_v6  ;;  %574 = vst [vmem:[%s520_s29 + $0x18] sm:$0xff] %v573_v7 }
  0x79 PF: > { %p2906_p5 = scmp.ge.s32.totalorder %s3662_s23, 1  ;;  %p663_p6 = scmp.lt.s32.totalorder %s3662_s23, 73 }
  0x7b   : > { %p664_p7 = pnand %p2906_p5, %p663_p6 }
  0x7c   : > { %s4643_s19 = sld [smem:[#allocation15_spill]] (!%p664_p7)  ;;  %s4644_s24 = sld [smem:[#allocation20_spill]] (!%p664_p7) }
  0x7d   : > { %667 = sbr.rel (%p664_p7) target bundleno = 1087 (0x43f), region = 120  ;;  %s4645_s7 = sld [smem:[#allocation19_spill]] (!%p664_p7) }
  0x7e   : > { %s4646_s28 = sld [smem:[#allocation18_spill]] (!%p664_p7)  ;;  %s670_s17 = sand.u32 (!%p664_p7), 1, %s3630_s15  }
  0x7f   : > { %s3920_s8 = sshll.u32 (!%p664_p7), %s670_s17, 5  ;;  %s4599_s1 = sand.u32 (!%p664_p7), 1, %s3614_s12  }
  0x80   : > { %s3928_s9 = sshll.u32 (!%p664_p7), %s4599_s1, 5  ;;  %s672_s30 = scalar_lea.vmem (!%p664_p7), [#allocation7], %s3920_s8 }
  0x82   : > { %s677_s18 = sand.u32 (!%p664_p7), 1, %s4643_s19   ;;  %s2910_s10 = sshll.u32 (!%p664_p7), %s4644_s24, 1 }
  0x83   : > { %s3922_s0 = sshll.u32 (!%p664_p7), %s677_s18, 5  ;;  %p787_p8 = scmp.lt.s32.totalorder (!%p664_p7), %s2910_s10, 5 }
  0x84   : > { %s802_s26 = sld [smem:[#allocation4 + %s4645_s7]]  ;;  %s803_s11 = sshra.s32 %s4646_s28, 7 }
  0x85   : > { %s4696_s10 = smov (!%p787_p8, %s2910_s10), 5  ;;  %s808_s15 = sand.u32 127, %s4646_s28 }
  0x86   : > { %s3067_s27 = sshll.u32 %s4696_s10, 3  ;;  %s805_s29 = sadd.s32 %s4645_s7, %s803_s11 }
  0x87   : > { %s4647_s18 = sld [smem:[#allocation31_spill]]  ;;  %s2913_s1 = sshll.u32 %s805_s29, 7 }
  0x88   : > { %s809_s4 = sadd.s32 %s2913_s1, %s808_s15  ;;  %s836_s6 = sld [smem:[#allocation4 + %s4645_s7]] }
  0x89   : > { %s810_s22 = sld [smem:[#allocation5 + %s809_s4]]  ;;  %p910_p11 = scmp.eq.s32.totalorder %s4645_s7, 0 }
  0x8a   : > { %p811_p9 = scmp.lt.s32.totalorder %s802_s26, 7  ;;  %s844_s21 = sld [smem:[#allocation5 + %s809_s4]] }
  0x8b   : > { %s861_s13 = sld [smem:[#allocation4 + %s4645_s7]]  ;;  %p911_p13 = scmp.eq.s32.totalorder %s4646_s28, 0 }
  0x8c   : > { %s4698_s26 = smov (!%p811_p9, %s802_s26), 7  ;;  %s869_s16 = sld [smem:[#allocation5 + %s809_s4]] }
  0x8d   : > { %s3940_s24 = scalar_lea.vmem %s4647_s18, %s3067_s27  ;;  %s3945_s20 = sld [smem:[#allocation4 + %s4645_s7]] }
  0x8e   : > { %s3330_s14 = smul.u32 3, %s4698_s26  ;;  %s896_s5 = sld [smem:[#allocation4 + %s4645_s7]] }
  0x8f   : > { %p845_p10 = scmp.lt.s32.totalorder %s836_s6, 7  ;;  %p813_p12 = scmp.lt.s32.totalorder %s810_s22, 2 }
  0x90   : > { %p847_p0 = scmp.lt.s32.totalorder %s844_s21, 2  ;;  %p3967_p6 = pnand %p911_p13, %p910_p11 }
  0x91   : > { %s4700_s6 = smov (!%p845_p10, %s836_s6), 7  ;;  %s4702_s22 = smov (!%p813_p12, %s810_s22), 2 }
  0x92   : > { %s3331_s1 = smul.u32 3, %s4700_s6  ;;  %s3950_s11 = sadd.s32 %s3330_s14, %s4702_s22  ;;  %v3667_v8 = vmov (!%p3967_p6), 0.0  }
  0x93   : > { %s2916_s15 = sshll.u32 %s869_s16, 1  ;;  %p871_p2 = scmp.lt.s32.totalorder %s861_s13, 7  ;;  %916 = vst [vmem:[#allocation2] sm:$0xff] (!%p3967_p6), %v3667_v8  ;;  %917 = vst [vmem:[#allocation2 + $0x8] sm:$0xff] (!%p3967_p6), %v3667_v8 }
  0x94   : > { %s4704_s21 = smov (!%p847_p0, %s844_s21), 2  ;;  %p873_p4 = scmp.lt.s32.totalorder %s2916_s15, 5  ;;  %918 = vst [vmem:[#allocation2 + $0x10] sm:$0xff] (!%p3967_p6), %v3667_v8  ;;  %919 = vst [vmem:[#allocation2 + $0x18] sm:$0xff] (!%p3967_p6), %v3667_v8 }
  0x95   : > { %s4706_s13 = smov (!%p871_p2, %s861_s13), 7  ;;  %s3956_s19 = sadd.s32 %s3331_s1, %s4704_s21 }
  0x96   : > { %s3332_s14 = smul.u32 12, %s4706_s13  ;;  %s4708_s15 = smov (!%p873_p4, %s2916_s15), 5 }
  0x97   : > { %p891_p5 = scmp.lt.s32.totalorder %s3945_s20, 7  ;;  %s2917_s16 = sshll.u32 %s4708_s15, 1 }
  0x98   : > { %s877_s21 = sadd.s32 %s3332_s14, %s2917_s16  ;;  %p898_p7 = scmp.lt.s32.totalorder %s896_s5, 7 }
  0x99   : > { %s2918_s1 = sshll.u32 %s877_s21, 3  ;;  %s4651_s29 = sld [smem:[#allocation36_spill]] }
  0x9a   : > { %s4710_s20 = smov (!%p891_p5, %s3945_s20), 7  ;;  %s4712_s5 = smov (!%p898_p7, %s896_s5), 7 }
  0x9b   : > { %s2919_s13 = sshll.u32 %s4710_s20, 1  ;;  %s4652_s7 = sld [smem:[#allocation37_spill]] }
  0x9c   : > { %s3333_s18 = smul.u32 6, %s4712_s5  ;;  %s4653_s16 = sld [smem:[#allocation38_spill]] }
  0x9d   : > { %s3990_s4 = scalar_lea.vmem [#allocation8], %s3922_s0  ;;  %915 = sbr.rel (%p3967_p6) target bundleno = 164 (0xa4), region = 132 }
  0x9e   : > { %s903_s6 = sadd.s32 %s3333_s18, %s4696_s10 }
  0x9f   : > { %s3974_s2 = scalar_lea.vmem %s4651_s29, %s2918_s1  ;;  %s2921_s26 = sshll.u32 %s903_s6, 3 }
  0xa0   : > { %s3993_s1 = scalar_lea.vmem [#allocation9], %s3928_s9 }
  0xa1   : > { %s3980_s28 = scalar_lea.vmem %s4652_s7, %s2919_s13 }
  0xa2   : > { %s3986_s21 = scalar_lea.vmem %s4653_s16, %s2921_s26 }
  0xa4 PF: > { %s4654_s5 = sld [smem:[#allocation19_spill]] }
  0xaa   : > { %s920_s20 = sld [smem:[#allocation6 + %s4654_s5]] }
  0xb0   : > { %p2922_p8 = scmp.ne.s32.totalorder %s920_s20, 1 }
  0xb1   : > { %v3999_v9 = vld [vmem:[%s3940_s24] ss:$8 sps:$4 sm:$0xff] (!%p2922_p8)   ;;  %s3668_s3 = smov (!%p2922_p8), 96   ;;  %s3669_s8 = smov (!%p2922_p8), 32   ;;  %v4010_v12 = vld [vmem:[%s3940_s24 + $0x4] ss:$8 sps:$4 sm:$0xff] (!%p2922_p8)  }
  0xb2   : > { %924 = sbr.rel (%p2922_p8) target bundleno = 1042 (0x412), region = 136  ;;  %v4001_v10 = vld [vmem:[%s672_s30] sm:$0xff] (!%p2922_p8)  ;;  %v4003_v11 = vld [vmem:[%s672_s30 + $0x8] sm:$0xff] (!%p2922_p8)  ;;  %1034 = vrot.lane.b32.xlu0 (!%p2922_p8), %v3999_v9, %s3668_s3  ;;  %1386 = vrot.lane.b32.xlu1 (!%p2922_p8), %v3999_v9, %s3669_s8  ;;  %v3670_v16 = vmov (!%p2922_p8), 0.0   ;;  %vm3671_vm0 = vmmov (!%p2922_p8), 0   ;;  %s4655_s9 = sld [smem:[#allocation33_spill]] (!%p2922_p8) }
  0xb3   : > { %v985_v13 = vshra.s32 (!%p2922_p8), %v4001_v10, 4  ;;  %v986_v14 = vshra.s32 (!%p2922_p8), %v4003_v11, 4  ;;  %v4014_v15 = vld [vmem:[%s672_s30 + $0x10] sm:$0xff] (!%p2922_p8)  ;;  %3118 = vmatprep.subr.bf16.mxu1 (!%p2922_p8), %v3670_v16  ;;  %v4017_v17 = vld [vmem:[%s672_s30 + $0x18] sm:$0xff] (!%p2922_p8)  ;;  %3122 = vmatprep.mubr.msk.bf16.mxu1 (!%p2922_p8), %vm3671_vm0, %v3670_v16  ;;  %v937_v19 = vand.u32 (!%p2922_p8), 15, %v4001_v10  ;;  %v938_v20 = vand.u32 (!%p2922_p8), 15, %v4003_v11 }
  0xb4   : > { %v987_v18 = vshra.s32 (!%p2922_p8), %v4014_v15, 4  ;;  %v988_v23 = vshra.s32 (!%p2922_p8), %v4017_v17, 4  ;;  %3182 = vmatprep.subr.bf16.mxu0 (!%p2922_p8), %v3670_v16  ;;  %v1477_v24 = vshra.s32 (!%p2922_p8), %v4001_v10, 16  ;;  %3186 = vmatprep.mubr.msk.bf16.mxu0 (!%p2922_p8), %vm3671_vm0, %v3670_v16  ;;  %v1478_v28 = vshra.s32 (!%p2922_p8), %v4003_v11, 16  ;;  %s3672_s30 = smov (!%p2922_p8), 64   ;;  %s4657_s6 = sld [smem:[#allocation35_spill]] (!%p2922_p8) }
  0xb5   : > { %v989_v21 = vand.u32 (!%p2922_p8), 15, %v985_v13  ;;  %v990_v22 = vand.u32 (!%p2922_p8), 15, %v986_v14  ;;  %v2923_v26 = vadd.s32 (!%p2922_p8), 4294967288, %v937_v19  ;;  %v2924_v27 = vadd.s32 (!%p2922_p8), 4294967288, %v938_v20  ;;  %s3675_s27 = smov (!%p2922_p8), 80   ;;  %s3676_s29 = smov (!%p2922_p8), 48  }
  0xb6   : > { %v991_v25 = vand.u32 (!%p2922_p8), 15, %v987_v18  ;;  %1657 = vrot.lane.b32.xlu1 (!%p2922_p8), %v4010_v12, %s3668_s3  ;;  %1251 = vrot.lane.b32.xlu0 (!%p2922_p8), %v3999_v9, %s3672_s30  ;;  %v992_v31 = vand.u32 (!%p2922_p8), 15, %v988_v23  ;;  %v1481_v32 = vand.u32 (!%p2922_p8), 15, %v1477_v24  ;;  %v1482_v37 = vand.u32 (!%p2922_p8), 15, %v1478_v28 }
  0xb7   : > { %v2933_v29 = vadd.s32 (!%p2922_p8), 4294967288, %v989_v21  ;;  %v2934_v30 = vadd.s32 (!%p2922_p8), 4294967288, %v990_v22  ;;  %v953_v35 = vcvt.s32.f32 (!%p2922_p8), %v2923_v26  ;;  %v954_v36 = vcvt.s32.f32 (!%p2922_p8), %v2924_v27 }
  0xb8   : > { %s4656_s24 = scalar_lea.vmem (!%p2922_p8), %s4655_s9, %s3950_s11  ;;  %v2935_v34 = vadd.s32 (!%p2922_p8), 4294967288, %v991_v25  ;;  %v2936_v40 = vadd.s32 (!%p2922_p8), 4294967288, %v992_v31  ;;  %v2966_v41 = vadd.s32 (!%p2922_p8), 4294967288, %v1481_v32  ;;  %v2967_v45 = vadd.s32 (!%p2922_p8), 4294967288, %v1482_v37 }
  0xb9   : > { %v4039_v33 = vld [vmem:[%s4656_s24] ss:$0 sm:$0xff]  ;;  %v1009_v38 = vcvt.s32.f32 %v2933_v29  ;;  %v1010_v39 = vcvt.s32.f32 %v2934_v30  ;;  %v1479_v53 = vshra.s32 %v4014_v15, 16  ;;  %v1480_v57 = vshra.s32 %v4017_v17, 16 }
  0xba   : > { %v1011_v42 = vcvt.s32.f32 %v2935_v34  ;;  %v4042_v43 = vmul.f32 %v4039_v33, %v953_v35  ;;  %v4045_v44 = vmul.f32 %v4039_v33, %v954_v36  ;;  %1792 = vrot.lane.b32.xlu0 %v4010_v12, %s3672_s30  ;;  %1927 = vrot.lane.b32.xlu1 %v4010_v12, %s3669_s8  ;;  %v1012_v48 = vcvt.s32.f32 %v2936_v40  ;;  %s4658_s22 = scalar_lea.vmem %s4657_s6, %s3956_s19  ;;  %s3674_s19 = smov 112  }
  0xbb   : > { %v1013_v46 = vmul.f32 %v4039_v33, %v1009_v38  ;;  %v1014_v47 = vmul.f32 %v4039_v33, %v1010_v39  ;;  %v1501_v49 = vcvt.s32.f32 %v2966_v41  ;;  %v1502_v52 = vcvt.s32.f32 %v2967_v45 }
  0xbc   : > { %v1015_v50 = vmul.f32 %v4039_v33, %v1011_v42  ;;  %v967_v51 = vpack.c.bf16 %v4045_v44, %v4042_v43  ;;  %v1016_v55 = vmul.f32 %v4039_v33, %v1012_v48  ;;  %v1483_v59 = vand.u32 15, %v1479_v53 }
  0xbd   : > { %v1017_v54 = vpack.c.bf16 %v1014_v47, %v1013_v46  ;;  %v1505_v56 = vmul.f32 %v4039_v33, %v1501_v49  ;;  %v1506_v58 = vmul.f32 %v4039_v33, %v1502_v52  ;;  %v939_v60 = vand.u32 15, %v4014_v15 }
  0xbe   : > { %v940_v61 = vand.u32 15, %v4017_v17  ;;  %v1018_v62 = vpack.c.bf16 %v1016_v55, %v1015_v50  ;;  %v1484_v63 = vand.u32 15, %v1480_v57  ;;  %v2968_v1 = vadd.s32 4294967288, %v1483_v59 }
  0xbf   : > { %3119 = vmatpush3.bf16.msra.mxu1 %v1017_v54  ;;  %v1509_v0 = vpack.c.bf16 %v1506_v58, %v1505_v56  ;;  %v2925_v2 = vadd.s32 4294967288, %v939_v60  ;;  %v1613_v5 = vshra.s32 %v4001_v10, 20  ;;  %v1614_v13 = vshra.s32 %v4003_v11, 20 }
  0xc0   : > { %3120 = vmatprep.subr.bf16.mxu1 %v3670_v16  ;;  %v2926_v3 = vadd.s32 4294967288, %v940_v61  ;;  %v2969_v4 = vadd.s32 4294967288, %v1484_v63  ;;  %v1503_v6 = vcvt.s32.f32 %v2968_v1  ;;  %v1615_v30 = vshra.s32 %v4014_v15, 20 }
  0xc1   : > { %3183 = vmatpush3.bf16.msra.mxu0 %v1509_v0  ;;  %v955_v7 = vcvt.s32.f32 %v2925_v2  ;;  %v1617_v18 = vand.u32 15, %v1613_v5  ;;  %v1618_v22 = vand.u32 15, %v1614_v13  ;;  %v1616_v32 = vshra.s32 %v4017_v17, 20 }
  0xc2   : > { %v956_v8 = vcvt.s32.f32 %v2926_v3  ;;  %3184 = vmatprep.subr.bf16.mxu0 %v3670_v16  ;;  %v1504_v14 = vcvt.s32.f32 %v2969_v4  ;;  %v1507_v19 = vmul.f32 %v4039_v33, %v1503_v6  ;;  %v1619_v35 = vand.u32 15, %v1615_v30 }
  0xc3   : > { %3121 = vmatpush3.bf16.msra.mxu1 %v1018_v62  ;;  %v4070_v20 = vmul.f32 %v4039_v33, %v955_v7  ;;  %v2977_v24 = vadd.s32 4294967288, %v1617_v18  ;;  %v2978_v26 = vadd.s32 4294967288, %v1618_v22  ;;  %vm1036_vm1 = vcmask 261120  }
  0xc4   : > { %3126 = vmatprep.subr.bf16.mxu1 %v3670_v16  ;;  %v4073_v21 = vmul.f32 %v4039_v33, %v956_v8  ;;  %v1508_v23 = vmul.f32 %v4039_v33, %v1504_v14  ;;  %v1620_v36 = vand.u32 15, %v1616_v32  ;;  %v1748_v37 = vshra.s32 %v4001_v10, 24 }
  0xc5   : > { %v1637_v28 = vcvt.s32.f32 %v2977_v24  ;;  %v1638_v29 = vcvt.s32.f32 %v2978_v26  ;;  %v2979_v39 = vadd.s32 4294967288, %v1619_v35  ;;  %v1749_v41 = vshra.s32 %v4003_v11, 24 }
  0xc6   : > { %v968_v25 = vpack.c.bf16 %v4073_v21, %v4070_v20  ;;  %v1510_v27 = vpack.c.bf16 %v1508_v23, %v1507_v19  ;;  %v2980_v40 = vadd.s32 4294967288, %v1620_v36  ;;  %v1752_v45 = vand.u32 15, %v1748_v37 }
  0xc7   : > { %v1641_v31 = vmul.f32 %v4039_v33, %v1637_v28  ;;  %v1642_v34 = vmul.f32 %v4039_v33, %v1638_v29  ;;  %v1639_v42 = vcvt.s32.f32 %v2979_v39  ;;  %v1753_v47 = vand.u32 15, %v1749_v41 }
  0xc8   : > { %3185 = vmatpush3.bf16.msra.mxu0 %v1510_v27  ;;  %v1640_v46 = vcvt.s32.f32 %v2980_v40  ;;  %v2987_v49 = vadd.s32 4294967288, %v1752_v45  ;;  %v1750_v54 = vshra.s32 %v4014_v15, 24  ;;  %v1751_v55 = vshra.s32 %v4017_v17, 24 }
  0xc9   : > { %3198 = vmatprep.subr.bf16.mxu0 %v3670_v16  ;;  %v1645_v38 = vpack.c.bf16 %v1642_v34, %v1641_v31  ;;  %v1643_v48 = vmul.f32 %v4039_v33, %v1639_v42  ;;  %v2988_v52 = vadd.s32 4294967288, %v1753_v47  ;;  %v1207_v62 = vshra.s32 %v4001_v10, 8 }
  0xca   : > { %v1644_v50 = vmul.f32 %v4039_v33, %v1640_v46  ;;  %v1772_v53 = vcvt.s32.f32 %v2987_v49  ;;  %v1754_v59 = vand.u32 15, %v1750_v54  ;;  %v1755_v60 = vand.u32 15, %v1751_v55 }
  0xcb   : > { %3187 = vmatmul.mubr.msk.bf16.vlgmr.msra.gmra.mrb[0].mxu0 %vm1036_vm1, %v4010_v12  ;;  %v1773_v57 = vcvt.s32.f32 %v2988_v52  ;;  %v1208_v63 = vshra.s32 %v4003_v11, 8  ;;  %v1209_v2 = vshra.s32 %v4014_v15, 8  ;;  %v1211_v4 = vand.u32 15, %v1207_v62 }
  0xcc   : > { %3202 = vmatprep.mubr.msk.bf16.mxu0 %vm3671_vm0, %v3670_v16  ;;  %3199 = vmatpush3.bf16.msra.mxu0 %v1645_v38  ;;  %v1646_v56 = vpack.c.bf16 %v1644_v50, %v1643_v48  ;;  %v4095_v58 = vmul.f32 %v4039_v33, %v1772_v53  ;;  %v2989_v0 = vadd.s32 4294967288, %v1754_v59  ;;  %v2990_v1 = vadd.s32 4294967288, %v1755_v60 }
  0xcd   : > { %3200 = vmatprep.subr.bf16.mxu0 %v3670_v16  ;;  %v4098_v61 = vmul.f32 %v4039_v33, %v1773_v57  ;;  %v1212_v5 = vand.u32 15, %v1208_v63  ;;  %v1210_v8 = vshra.s32 %v4017_v17, 8  ;;  %v1213_v13 = vand.u32 15, %v1209_v2 }
  0xce   : > { %v1774_v6 = vcvt.s32.f32 %v2989_v0  ;;  %v1775_v7 = vcvt.s32.f32 %v2990_v1  ;;  %v2946_v14 = vadd.s32 4294967288, %v1211_v4  ;;  %v2997_v19 = vshrl.u32 %v4001_v10, 28 }
  0xcf   : > { %v1780_v3 = vpack.c.bf16 %v4098_v61, %v4095_v58  ;;  %v2947_v18 = vadd.s32 4294967288, %v1212_v5  ;;  %v1214_v24 = vand.u32 15, %v1210_v8  ;;  %v2948_v26 = vadd.s32 4294967288, %v1213_v13 }
  0xd0   : > { %3201 = vmatpush3.bf16.msra.mxu0 %v1646_v56  ;;  %v4109_v22 = vmul.f32 %v4039_v33, %v1774_v6  ;;  %v4112_v23 = vmul.f32 %v4039_v33, %v1775_v7  ;;  %v1231_v27 = vcvt.s32.f32 %v2946_v14  ;;  %v2998_v29 = vshrl.u32 %v4003_v11, 28 }
  0xd1   : > { %3214 = vmatprep.subr.bf16.mxu0 %v3670_v16  ;;  %v1232_v28 = vcvt.s32.f32 %v2947_v18  ;;  %v3001_v30 = vadd.s32 4294967288, %v2997_v19  ;;  %v2949_v32 = vadd.s32 4294967288, %v1214_v24  ;;  %v1233_v34 = vcvt.s32.f32 %v2948_v26 }
  0xd2   : > { %v1781_v31 = vpack.c.bf16 %v4112_v23, %v4109_v22  ;;  %v4118_v35 = vmul.f32 %v4039_v33, %v1231_v27  ;;  %v3002_v37 = vadd.s32 4294967288, %v2998_v29  ;;  %v2999_v46 = vshrl.u32 %v4014_v15, 28  ;;  %v2034_v29 = vld [vmem:[%s3986_s21] sm:$0xff] }
  0xd3   : > { %v4121_v36 = vmul.f32 %v4039_v33, %v1232_v28  ;;  %v1907_v38 = vcvt.s32.f32 %v3001_v30  ;;  %v1234_v39 = vcvt.s32.f32 %v2949_v32  ;;  %v4124_v40 = vmul.f32 %v4039_v33, %v1233_v34  ;;  %v2035_v30 = vld [vmem:[%s3986_s21 + $0x8] sm:$0xff]  ;;  %v4174_v32 = vld [vmem:[%s3990_s4] sm:$0xff] }
  0xd4   : > { %v1908_v42 = vcvt.s32.f32 %v3002_v37  ;;  %v3000_v48 = vshrl.u32 %v4017_v17, 28  ;;  %v3003_v50 = vadd.s32 4294967288, %v2999_v46  ;;  %v1342_v57 = vshra.s32 %v4001_v10, 12  ;;  %v4177_v34 = vld [vmem:[%s3990_s4 + $0x8] sm:$0xff] }
  0xd5   : > { %v1239_v41 = vpack.c.bf16 %v4121_v36, %v4118_v35  ;;  %v4129_v45 = vmul.f32 %v4039_v33, %v1907_v38  ;;  %v4133_v47 = vmul.f32 %v4039_v33, %v1234_v39  ;;  %v1343_v60 = vshra.s32 %v4003_v11, 12  ;;  %v4184_v39 = vld [vmem:[%s3990_s4 + $0x10] sm:$0xff] }
  0xd6   : > { %v4137_v49 = vmul.f32 %v4039_v33, %v1908_v42  ;;  %v3004_v53 = vadd.s32 4294967288, %v3000_v48  ;;  %v1909_v55 = vcvt.s32.f32 %v3003_v50  ;;  %v1346_v63 = vand.u32 15, %v1342_v57  ;;  %v4187_v42 = vld [vmem:[%s3990_s4 + $0x18] sm:$0xff] }
  0xd7   : > { %v1240_v52 = vpack.c.bf16 %v4133_v47, %v4124_v40  ;;  %v1344_v0 = vshra.s32 %v4014_v15, 12  ;;  %v1347_v1 = vand.u32 15, %v1343_v60  ;;  %v1345_v2 = vshra.s32 %v4017_v17, 12 }
  0xd8   : > { %v1915_v54 = vpack.c.bf16 %v4137_v49, %v4129_v45  ;;  %v1910_v56 = vcvt.s32.f32 %v3004_v53  ;;  %v4145_v59 = vmul.f32 %v4039_v33, %v1909_v55  ;;  %v2956_v5 = vadd.s32 4294967288, %v1346_v63 }
  0xd9   : > { %v1348_v10 = vand.u32 15, %v1344_v0  ;;  %v2957_v6 = vadd.s32 4294967288, %v1347_v1  ;;  %v1349_v7 = vand.u32 15, %v1345_v2  ;;  %v3673_v37 = vmov 0  }
  0xda   : > { %v4149_v62 = vmul.f32 %v4039_v33, %v1910_v56  ;;  %v1366_v11 = vcvt.s32.f32 %v2956_v5  ;;  %3469 = vset.pattern.permute.xlu0 %v3673_v37  ;;  %3470 = vset.pattern.permute.xlu1 %v3673_v37  ;;  %v997_v38 = vshra.s32 %v4174_v32, 4  ;;  %v999_v50 = vshra.s32 %v4184_v39, 4 }
  0xdb   : > { %v2958_v8 = vadd.s32 4294967288, %v1348_v10  ;;  %v1367_v13 = vcvt.s32.f32 %v2957_v6  ;;  %v2959_v14 = vadd.s32 4294967288, %v1349_v7  ;;  %2038 = vperm.xlu0 %3469, %v2034_v29   ;;  %2043 = vperm.xlu1 %3470, %v2035_v30   ;;  %v1000_v53 = vshra.s32 %v4187_v42, 4  ;;  %v4205_v6 = vld [vmem:[%s4658_s22] ss:$0 sm:$0xff] }
  0xdc   : > { %v1916_v4 = vpack.c.bf16 %v4149_v62, %v4145_v59  ;;  %v4156_v15 = vmul.f32 %v4039_v33, %v1366_v11  ;;  %v1001_v46 = vand.u32 15, %v997_v38  ;;  %v1003_v57 = vand.u32 15, %v999_v50 }
  0xdd   : > { %v1368_v18 = vcvt.s32.f32 %v2958_v8  ;;  %v4159_v17 = vmul.f32 %v4039_v33, %v1367_v13  ;;  %v1369_v19 = vcvt.s32.f32 %v2959_v14  ;;  %v1004_v60 = vand.u32 15, %v1000_v53 }
  0xde   : > { %v2937_v55 = vadd.s32 4294967288, %v1001_v46  ;;  %v2939_v5 = vadd.s32 4294967288, %v1003_v57  ;;  %v945_v10 = vand.u32 15, %v4174_v32  ;;  %v946_v11 = vand.u32 15, %v4177_v34 }
  0xdf   : > { %v4162_v24 = vmul.f32 %v4039_v33, %v1368_v18  ;;  %v1374_v26 = vpack.c.bf16 %v4159_v17, %v4156_v15  ;;  %v4167_v27 = vmul.f32 %v4039_v33, %v1369_v19  ;;  %v998_v33 = vshra.s32 %v4177_v34, 4 }
  0xe0   : > { %v1019_v1 = vcvt.s32.f32 %v2937_v55  ;;  %v2940_v7 = vadd.s32 4294967288, %v1004_v60  ;;  %v1021_v44 = vcvt.s32.f32 %v2939_v5  ;;  %v2928_v18 = vadd.s32 4294967288, %v946_v11 }
  0xe1   : > { %v1375_v28 = vpack.c.bf16 %v4167_v27, %v4162_v24  ;;  %v1002_v48 = vand.u32 15, %v998_v33  ;;  %v947_v19 = vand.u32 15, %v4184_v39  ;;  %v948_v29 = vand.u32 15, %v4187_v42 }
  0xe2   : > { %v1023_v13 = vmul.f32 %v4205_v6, %v1019_v1  ;;  %v1022_v14 = vcvt.s32.f32 %v2940_v7  ;;  %v1025_v21 = vmul.f32 %v4205_v6, %v1021_v44  ;;  %v970_v61 = vcvt.s32.f32 %v2928_v18 }
  0xe3   : > { %v2938_v56 = vadd.s32 4294967288, %v1002_v48  ;;  %v2930_v38 = vadd.s32 4294967288, %v948_v29  ;;  %v1219_v22 = vshra.s32 %v4174_v32, 8  ;;  %v1220_v23 = vshra.s32 %v4177_v34, 8 }
  0xe4   : > { %v1026_v58 = vmul.f32 %v4205_v6, %v1022_v14  ;;  %v980_v48 = vmul.f32 %v4205_v6, %v970_v61  ;;  %v1221_v5 = vshra.s32 %v4184_v39, 8  ;;  %v1222_v45 = vshra.s32 %v4187_v42, 8 }
  0xe5   : > { %v1020_v2 = vcvt.s32.f32 %v2938_v56  ;;  %v972_v53 = vcvt.s32.f32 %v2930_v38  ;;  %v1223_v60 = vand.u32 15, %v1219_v22  ;;  %v1224_v1 = vand.u32 15, %v1220_v23 }
  0xe6   : > { %v1028_v46 = vpack.c.bf16 %v1026_v58, %v1025_v21  ;;  %v1226_v7 = vand.u32 15, %v1222_v45  ;;  %v1354_v14 = vshra.s32 %v4174_v32, 12  ;;  %v1355_v18 = vshra.s32 %v4177_v34, 12 }
  0xe7   : > { %v1024_v43 = vmul.f32 %v4205_v6, %v1020_v2  ;;  %v982_v57 = vmul.f32 %v4205_v6, %v972_v53  ;;  %v2950_v49 = vadd.s32 4294967288, %v1223_v60  ;;  %v1357_v29 = vshra.s32 %v4187_v42, 12 }
  0xe8   : > { %v2953_v44 = vadd.s32 4294967288, %v1226_v7  ;;  %v1489_v21 = vshra.s32 %v4174_v32, 16  ;;  %v1492_v22 = vshra.s32 %v4187_v42, 16  ;;  %v1625_v15 = vshra.s32 %v4174_v32, 20 }
  0xe9   : > { %v1027_v20 = vpack.c.bf16 %v1024_v43, %v1023_v13  ;;  %v1241_v11 = vcvt.s32.f32 %v2950_v49  ;;  %v1361_v58 = vand.u32 15, %v1357_v29  ;;  %v1626_v7 = vshra.s32 %v4177_v34, 20 }
  0xea   : > { %vm2108_vm2 = vcmask 130048  }
  0xeb   : > { %v1245_v59 = vmul.f32 %v4205_v6, %v1241_v11 }
 0x124   : > { %v1035_v63 = vpop.permute.xlu0 %1034  ;;  %v4191_v0 = vpop.permute.xlu1 %1386 }
 0x125   : > { %3123 = vmatmul.mubr.msk.bf16.vlgmr.msra.gmra.mrb[0].mxu1 %vm1036_vm1, %v1035_v63 }
 0x126   : > { %3127 = vmatpush3.bf16.msra.mxu1 %v967_v51  ;;  %3130 = vmatprep.mubr.msk.bf16.mxu1 %vm3671_vm0, %v3670_v16  ;;  %v2927_v51 = vadd.s32 4294967288, %v945_v10  ;;  %v1225_v10 = vand.u32 15, %v1221_v5  ;;  %v1496_v5 = vand.u32 15, %v1492_v22 }
 0x127   : > { %3128 = vmatprep.subr.bf16.mxu1 %v3670_v16 }
 0x128   : > { %v4209_v8 = vpop.permute.xlu1 %1657  ;;  %v4225_v30 = vpop.permute.xlu0 %1251  ;;  %v2952_v43 = vadd.s32 4294967288, %v1225_v10  ;;  %v2973_v10 = vadd.s32 4294967288, %v1496_v5 }
 0x129   : > { %3203 = vmatmul.mubr.msk.bf16.vlgmr.msra.gmra.mrb[0].mxu0 %vm1036_vm1, %v4209_v8 }
 0x12a   : > { %3129 = vmatpush3.bf16.msra.mxu1 %v968_v25  ;;  %3215 = vmatpush3.bf16.msra.mxu0 %v1780_v3  ;;  %v969_v25 = vcvt.s32.f32 %v2927_v51  ;;  %v2929_v3 = vadd.s32 4294967288, %v947_v19  ;;  %v1244_v51 = vcvt.s32.f32 %v2953_v44  ;;  %v1356_v19 = vshra.s32 %v4184_v39, 12 }
 0x12b   : > { %3134 = vmatprep.subr.bf16.mxu1 %v3670_v16  ;;  %3216 = vmatprep.subr.bf16.mxu0 %v3670_v16  ;;  %v1629_v44 = vand.u32 15, %v1625_v15  ;;  %v1514_v27 = vcvt.s32.f32 %v2973_v10 }
 0x12c   : > { %3218 = vmatprep.mubr.msk.bf16.mxu0 %vm3671_vm0, %v3670_v16  ;;  %v979_v33 = vmul.f32 %v4205_v6, %v969_v25  ;;  %v971_v50 = vcvt.s32.f32 %v2929_v3  ;;  %v4241_v55 = vpop.permute.xlu0 %1792  ;;  %v1248_v36 = vmul.f32 %v4205_v6, %v1244_v51  ;;  %v1360_v25 = vand.u32 15, %v1356_v19 }
 0x12d   : > { %v1493_v3 = vand.u32 15, %v1489_v21  ;;  %v2981_v51 = vadd.s32 4294967288, %v1629_v44 }
 0x12e   : > { %3217 = vmatpush3.bf16.msra.mxu0 %v1781_v31  ;;  %v983_v31 = vpack.c.bf16 %v980_v48, %v979_v33  ;;  %v981_v56 = vmul.f32 %v4205_v6, %v971_v50  ;;  %v2962_v38 = vadd.s32 4294967288, %v1360_v25  ;;  %v2963_v33 = vadd.s32 4294967288, %v1361_v58 }
 0x12f   : > { %3230 = vmatprep.subr.bf16.mxu0 %v3670_v16  ;;  %v2970_v23 = vadd.s32 4294967288, %v1493_v3 }
 0x130   : > { %v984_v2 = vpack.c.bf16 %v982_v57, %v981_v56  ;;  %v1379_v56 = vcvt.s32.f32 %v2963_v33 }
 0x131   : > { %3131 = vmatmul.mubr.msk.bf16.vlgmr.msra.gmra.mrb[0].mxu1 %vm1036_vm1, %v3999_v9  ;;  %v1511_v45 = vcvt.s32.f32 %v2970_v23 }
 0x132   : > { %3135 = vmatpush3.bf16.msra.mxu1 %v1027_v20  ;;  %3138 = vmatprep.mubr.msk.bf16.mxu1 %vm3671_vm0, %v3670_v16  ;;  %v1359_v20 = vand.u32 15, %v1355_v18  ;;  %v1383_v49 = vmul.f32 %v4205_v6, %v1379_v56 }
 0x133   : > { %3136 = vmatprep.subr.bf16.mxu1 %v3670_v16  ;;  %v1515_v11 = vmul.f32 %v4205_v6, %v1511_v45 }
 0x134   : > { %v2961_v47 = vadd.s32 4294967288, %v1359_v20 }
 0x135   : > { %3219 = vmatmul.mubr.msk.bf16.vlgmr.msra.gmra.mrb[0].mxu0 %vm1036_vm1, %v4241_v55 }
 0x136   : > { %3137 = vmatpush3.bf16.msra.mxu1 %v1028_v46  ;;  %3231 = vmatpush3.bf16.msra.mxu0 %v1915_v54  ;;  %v2951_v54 = vadd.s32 4294967288, %v1224_v1  ;;  %v1491_v46 = vshra.s32 %v4184_v39, 16  ;;  %v1377_v50 = vcvt.s32.f32 %v2961_v47  ;;  %v1762_v47 = vshra.s32 %v4184_v39, 24 }
 0x137   : > { %3142 = vmatprep.subr.bf16.mxu1 %v3670_v16  ;;  %3232 = vmatprep.subr.bf16.mxu0 %v3670_v16 }
 0x138   : > { %3234 = vmatprep.mubr.msk.bf16.mxu0 %vm3671_vm0, %v3670_v16  ;;  %v1242_v13 = vcvt.s32.f32 %v2951_v54  ;;  %v1495_v57 = vand.u32 15, %v1491_v46  ;;  %v1381_v1 = vmul.f32 %v4205_v6, %v1377_v50  ;;  %v1766_v50 = vand.u32 15, %v1762_v47 }
 0x139   : > { %3139 = vmatmul.mubr.msk.bf16.vlgmr.msra.gmra.mrb[4].mxu1 %vm1036_vm1, %v1035_v63  ;;  %v4266_v63 = vpop.permute.xlu1 %1927 }
 0x13a   : > { %3143 = vmatpush3.bf16.msra.mxu1 %v983_v31  ;;  %3146 = vmatprep.mubr.msk.bf16.mxu1 %vm3671_vm0, %v3670_v16  ;;  %v1246_v62 = vmul.f32 %v4205_v6, %v1242_v13  ;;  %v1378_v31 = vcvt.s32.f32 %v2962_v38  ;;  %v2972_v54 = vadd.s32 4294967288, %v1495_v57 }
 0x13b   : > { %3144 = vmatprep.subr.bf16.mxu1 %v3670_v16  ;;  %3233 = vmatpush3.bf16.msra.mxu0 %v1916_v4  ;;  %v1243_v4 = vcvt.s32.f32 %v2952_v43 }
 0x13c   : > { %v1513_v43 = vcvt.s32.f32 %v2972_v54  ;;  %v3006_v54 = vshrl.u32 %v4177_v34, 28 }
 0x13d   : > { %v1247_v35 = vmul.f32 %v4205_v6, %v1243_v4 }
 0x13e   : > { %3145 = vmatpush3.bf16.msra.mxu1 %v984_v2  ;;  %v1517_v4 = vmul.f32 %v4205_v6, %v1513_v43 }
 0x13f   : > { %3150 = vmatprep.subr.bf16.mxu1 %v3670_v16  ;;  %v1250_v61 = vpack.c.bf16 %v1248_v36, %v1247_v35  ;;  %v1647_v35 = vcvt.s32.f32 %v2981_v51  ;;  %v1760_v36 = vshra.s32 %v4174_v32, 24  ;;  %v4378_v51 = vld [vmem:[%s3974_s2 + $0x8] sm:$0xff] }
 0x141   : > { %3235 = vmatmul.mubr.msk.bf16.vlgmr.msra.gmra.mrb[0].mxu0 %vm1036_vm1, %v4266_v63 }
 0x142   : > { %2144 = vmatprep.mubr.bf16.mxu0 %v3673_v37 }
 0x145   : > { %3147 = vmatmul.mubr.msk.bf16.vlgmr.msra.gmra.mrb[4].mxu1 %vm1036_vm1, %v3999_v9  ;;  %v1249_v9 = vpack.c.bf16 %v1246_v62, %v1245_v59  ;;  %v1627_v59 = vshra.s32 %v4184_v39, 20  ;;  %v1628_v62 = vshra.s32 %v4187_v42, 20 }
 0x146   : > { %3151 = vmatpush3.bf16.msra.mxu1 %v1239_v41  ;;  %3154 = vmatprep.mubr.msk.bf16.mxu1 %vm3671_vm0, %v3670_v16  ;;  %v1358_v41 = vand.u32 15, %v1354_v14 }
 0x147   : > { %3152 = vmatprep.subr.bf16.mxu1 %v3670_v16  ;;  %v1631_v14 = vand.u32 15, %v1627_v59  ;;  %v1632_v29 = vand.u32 15, %v1628_v62 }
 0x148   : > { %v2960_v40 = vadd.s32 4294967288, %v1358_v41  ;;  %v1761_v41 = vshra.s32 %v4177_v34, 24 }
 0x149   : > { %v2983_v25 = vadd.s32 4294967288, %v1631_v14  ;;  %v2984_v58 = vadd.s32 4294967288, %v1632_v29  ;;  %v4381_v14 = vld [vmem:[%s3974_s2 + $0x18] sm:$0xff]  ;;  %v2055_v29 = vand.u32 15, %v4378_v51 }
 0x14a   : > { %3153 = vmatpush3.bf16.msra.mxu1 %v1240_v52  ;;  %v1490_v52 = vshra.s32 %v4177_v34, 16  ;;  %v1376_v48 = vcvt.s32.f32 %v2960_v40  ;;  %v1765_v40 = vand.u32 15, %v1761_v41  ;;  %v2053_v41 = vld [vmem:[%s3980_s28] sm:$0x3] }
 0x14b   : > { %3158 = vmatprep.subr.bf16.mxu1 %v3670_v16  ;;  %v1649_v38 = vcvt.s32.f32 %v2983_v25  ;;  %v1650_v33 = vcvt.s32.f32 %v2984_v58  ;;  %v3018_v25 = vadd.s32 4294967288, %v2055_v29 }
 0x14c   : > { %v1494_v53 = vand.u32 15, %v1490_v52  ;;  %v1380_v60 = vmul.f32 %v4205_v6, %v1376_v48  ;;  %v1651_v52 = vmul.f32 %v4205_v6, %v1647_v35  ;;  %v2992_v48 = vadd.s32 4294967288, %v1765_v40 }
 0x14d   : > { %3155 = vmatmul.mubr.msk.bf16.vlgmr.msra.gmra.mrb[0].mxu1 %vm1036_vm1, %v4225_v30  ;;  %v1653_v23 = vmul.f32 %v4205_v6, %v1649_v38  ;;  %v2063_v38 = vcvt.s32.f32 %v3018_v25  ;;  %v2204_v25 = vshra.s32 %v4381_v14, 8 }
 0x14e   : > { %3159 = vmatpush3.bf16.msra.mxu1 %v1249_v9  ;;  %3162 = vmatprep.mubr.msk.bf16.mxu1 %vm3671_vm0, %v3670_v16  ;;  %v2971_v2 = vadd.s32 4294967288, %v1494_v53  ;;  %v1384_v17 = vpack.c.bf16 %v1381_v1, %v1380_v60  ;;  %v1518_v9 = vmul.f32 %v4205_v6, %v1514_v27  ;;  %v1783_v57 = vcvt.s32.f32 %v2992_v48 }
 0x14f   : > { %3160 = vmatprep.subr.bf16.mxu1 %v3670_v16  ;;  %v2993_v60 = vadd.s32 4294967288, %v1766_v50 }
 0x150   : > { %v1520_v20 = vpack.c.bf16 %v1518_v9, %v1517_v4  ;;  %v1787_v45 = vmul.f32 %v4205_v6, %v1783_v57  ;;  %v4386_v9 = vld [vmem:[%s3974_s2] sm:$0xff] }
 0x152   : > { %3161 = vmatpush3.bf16.msra.mxu1 %v1250_v61  ;;  %v1764_v61 = vand.u32 15, %v1760_v36 }
 0x153   : > { %3166 = vmatprep.subr.bf16.mxu1 %v3670_v16 }
 0x154   : > { %v2991_v46 = vadd.s32 4294967288, %v1764_v61 }
 0x155   : > { %3163 = vmatmul.mubr.msk.bf16.vlgmr.msra.gmra.mrb[4].mxu1 %vm1036_vm1, %v4225_v30  ;;  %v1382_v30 = vmul.f32 %v4205_v6, %v1378_v31  ;;  %v1654_v31 = vmul.f32 %v4205_v6, %v1650_v33 }
 0x156   : > { %3167 = vmatpush3.bf16.msra.mxu1 %v1374_v26  ;;  %3170 = vmatprep.mubr.msk.bf16.mxu1 %vm3671_vm0, %v3670_v16  ;;  %v1512_v26 = vcvt.s32.f32 %v2971_v2  ;;  %v1782_v56 = vcvt.s32.f32 %v2991_v46 }
 0x157   : > { %3168 = vmatprep.subr.bf16.mxu1 %v3670_v16  ;;  %v1385_v13 = vpack.c.bf16 %v1383_v49, %v1382_v30  ;;  %v1656_v2 = vpack.c.bf16 %v1654_v31, %v1653_v23  ;;  %v1784_v30 = vcvt.s32.f32 %v2993_v60 }
 0x158   : > { %v1516_v24 = vmul.f32 %v4205_v6, %v1512_v26  ;;  %v1786_v5 = vmul.f32 %v4205_v6, %v1782_v56 }
 0x15a   : > { %3169 = vmatpush3.bf16.msra.mxu1 %v1375_v28  ;;  %v1630_v28 = vand.u32 15, %v1626_v7  ;;  %v1519_v18 = vpack.c.bf16 %v1516_v24, %v1515_v11  ;;  %v1790_v15 = vpack.c.bf16 %v1787_v45, %v1786_v5  ;;  %v3010_v7 = vadd.s32 4294967288, %v3006_v54 }
 0x15b   : > { %3174 = vmatprep.subr.bf16.mxu1 %v3670_v16  ;;  %v3007_v11 = vshrl.u32 %v4184_v39, 28 }
 0x15c   : > { %v2982_v19 = vadd.s32 4294967288, %v1630_v28  ;;  %v1918_v34 = vcvt.s32.f32 %v3010_v7 }
 0x15d   : > { %3171 = vmatmul.mubr.msk.bf16.vlgmr.msra.gmra.mrb[0].mxu1 %vm1036_vm1, %v4191_v0  ;;  %v3011_v44 = vadd.s32 4294967288, %v3007_v11 }
 0x15e   : > { %3175 = vmatpush3.bf16.msra.mxu1 %v1384_v17  ;;  %3178 = vmatprep.mubr.msk.bf16.mxu1 %vm3671_vm0, %v3670_v16  ;;  %v1648_v21 = vcvt.s32.f32 %v2982_v19  ;;  %v1788_v17 = vmul.f32 %v4205_v6, %v1784_v30  ;;  %v4389_v19 = vld [vmem:[%s3974_s2 + $0x10] sm:$0xff]  ;;  %s3677_s2 = smov 16  }
 0x15f   : > { %3176 = vmatprep.subr.bf16.mxu1 %v3670_v16  ;;  %v1919_v24 = vcvt.s32.f32 %v3011_v44  ;;  %v2085_v36 = vshra.s32 %v4389_v19, 4 }
 0x160   : > { %v1652_v3 = vmul.f32 %v4205_v6, %v1648_v21 }
 0x161   : > { %v1923_v28 = vmul.f32 %v4205_v6, %v1919_v24 }
 0x162   : > { %3177 = vmatpush3.bf16.msra.mxu1 %v1385_v13  ;;  %v1655_v22 = vpack.c.bf16 %v1652_v3, %v1651_v52  ;;  %v3008_v13 = vshrl.u32 %v4187_v42, 28 }
 0x163   : > { %3190 = vmatprep.subr.bf16.mxu1 %v3670_v16 }
 0x164   : > { %v3012_v59 = vadd.s32 4294967288, %v3008_v13 }
 0x165   : > { %3179 = vmatmul.mubr.msk.bf16.vlgmr.msra.gmra.mrb[4].mxu1 %vm1036_vm1, %v4191_v0  ;;  %v1763_v0 = vshra.s32 %v4187_v42, 24  ;;  %v1922_v42 = vmul.f32 %v4205_v6, %v1918_v34 }
 0x166   : > { %3191 = vmatpush3.bf16.msra.mxu1 %v1519_v18  ;;  %3194 = vmatprep.mubr.msk.bf16.mxu1 %vm3671_vm0, %v3670_v16  ;;  %v2084_v18 = vshra.s32 %v4378_v51, 4 }
 0x167   : > { %3192 = vmatprep.subr.bf16.mxu1 %v3670_v16  ;;  %v1767_v53 = vand.u32 15, %v1763_v0  ;;  %v2089_v0 = vand.u32 15, %v2085_v36 }
 0x169   : > { %v2994_v1 = vadd.s32 4294967288, %v1767_v53  ;;  %v3023_v53 = vadd.s32 4294967288, %v2089_v0 }
 0x16a   : > { %3193 = vmatpush3.bf16.msra.mxu1 %v1520_v20  ;;  %v2088_v20 = vand.u32 15, %v2084_v18 }
 0x16b   : > { %3206 = vmatprep.subr.bf16.mxu1 %v3670_v16  ;;  %v1785_v49 = vcvt.s32.f32 %v2994_v1  ;;  %v2097_v56 = vcvt.s32.f32 %v3023_v53  ;;  %v2201_v53 = vshra.s32 %v4386_v9, 8 }
 0x16c   : > { %v3022_v52 = vadd.s32 4294967288, %v2088_v20 }
 0x16d   : > { %v1789_v26 = vmul.f32 %v4205_v6, %v1785_v49 }
 0x16f   : > { %v1791_v43 = vpack.c.bf16 %v1789_v26, %v1788_v17 }
 0x171   : > { %3195 = vmatmul.mubr.msk.bf16.vlgmr.msra.gmra.mrb[4].mxu1 %vm1036_vm1, %v4010_v12  ;;  %v3005_v12 = vshrl.u32 %v4174_v32, 28 }
 0x172   : > { %3207 = vmatpush3.bf16.msra.mxu1 %v1655_v22  ;;  %3210 = vmatprep.mubr.msk.bf16.mxu1 %vm3671_vm0, %v3670_v16  ;;  %v2096_v22 = vcvt.s32.f32 %v3022_v52 }
 0x173   : > { %3208 = vmatprep.subr.bf16.mxu1 %v3670_v16  ;;  %v3009_v10 = vadd.s32 4294967288, %v3005_v12 }
 0x175   : > { %v1917_v32 = vcvt.s32.f32 %v3009_v10 }
 0x176   : > { %3209 = vmatpush3.bf16.msra.mxu1 %v1656_v2 }
 0x177   : > { %3222 = vmatprep.subr.bf16.mxu1 %v3670_v16  ;;  %v1921_v39 = vmul.f32 %v4205_v6, %v1917_v32 }
 0x179   : > { %v1925_v27 = vpack.c.bf16 %v1922_v42, %v1921_v39 }
 0x17d   : > { %3211 = vmatmul.mubr.msk.bf16.vlgmr.msra.gmra.mrb[4].mxu1 %vm1036_vm1, %v4209_v8  ;;  %v1920_v8 = vcvt.s32.f32 %v3012_v59 }
 0x17e   : > { %3223 = vmatpush3.bf16.msra.mxu1 %v1790_v15  ;;  %3226 = vmatprep.mubr.msk.bf16.mxu1 %vm3671_vm0, %v3670_v16 }
 0x17f   : > { %3224 = vmatprep.subr.bf16.mxu1 %v3670_v16  ;;  %v1924_v62 = vmul.f32 %v4205_v6, %v1920_v8  ;;  %v2067_v6 = vlaneseq }
 0x181   : > { %v1926_v4 = vpack.c.bf16 %v1924_v62, %v1923_v28  ;;  %v2068_v35 = vshrl.u32 %v2067_v6, 7 }
 0x182   : > { %3225 = vmatpush3.bf16.msra.mxu1 %v1791_v43 }
 0x183   : > { %3238 = vmatprep.subr.bf16.mxu1 %v3670_v16  ;;  %v2069_v61 = vsub.s32 0, %v2068_v35  ;;  %v2073_v40 = vsub.s32 1, %v2068_v35 }
 0x185   : > { %v4396_v46 = vrot.slane %v2053_v41, %v2069_v61  ;;  %v4398_v48 = vrot.slane %v2053_v41, %v2073_v40  ;;  %v2056_v61 = vand.u32 15, %v4389_v19 }
 0x187   : > { %v2078_v57 = vmul.f32 %v4398_v48, %v2063_v38  ;;  %v2100_v1 = vmul.f32 %v2096_v22, %v4398_v48  ;;  %v2101_v45 = vmul.f32 %v2097_v56, %v4396_v46  ;;  %v3019_v52 = vadd.s32 4294967288, %v2056_v61 }
 0x188   : > { %v2203_v22 = vshra.s32 %v4389_v19, 8  ;;  %v2276_v56 = vshra.s32 %v4378_v51, 12 }
 0x189   : > { %3227 = vmatmul.mubr.msk.bf16.vlgmr.msra.gmra.mrb[4].mxu1 %vm1036_vm1, %v4241_v55  ;;  %v2086_v55 = vshra.s32 %v4381_v14, 4 }
 0x18a   : > { %3239 = vmatpush3.bf16.msra.mxu1 %v1925_v27  ;;  %3242 = vmatprep.mubr.msk.bf16.mxu1 %vm3671_vm0, %v3670_v16 }
 0x18b   : > { %3240 = vmatprep.subr.bf16.mxu1 %v3670_v16  ;;  %v2057_v16 = vand.u32 15, %v4381_v14  ;;  %v2090_v21 = vand.u32 15, %v2086_v55  ;;  %v2039_v55 = vpop.permute.xlu0 %2038 }
 0x18d   : > { %v3020_v58 = vadd.s32 4294967288, %v2057_v16  ;;  %v3024_v3 = vadd.s32 4294967288, %v2090_v21  ;;  %v2044_v16 = vpop.permute.xlu1 %2043  ;;  %v2202_v21 = vshra.s32 %v4378_v51, 8 }
 0x18e   : > { %3241 = vmatpush3.bf16.msra.mxu1 %v1926_v4 }
 0x18f   : > { %v2065_v33 = vcvt.s32.f32 %v3020_v58  ;;  %v2098_v23 = vcvt.s32.f32 %v3024_v3  ;;  %v2054_v58 = vand.u32 15, %v4386_v9  ;;  %v2206_v40 = vand.u32 15, %v2202_v21 }
 0x191   : > { %v2080_v60 = vmul.f32 %v4398_v48, %v2065_v33  ;;  %v2102_v2 = vmul.f32 %v2098_v23, %v4398_v48  ;;  %v3017_v0 = vadd.s32 4294967288, %v2054_v58  ;;  %v3028_v3 = vadd.s32 4294967288, %v2206_v40 }
 0x192   : > { %v2351_v58 = vshra.s32 %v4389_v19, 16 }
 0x193   : > { %v2104_v30 = vpack.c.bf16 %v2102_v2, %v2100_v1  ;;  %v2082_v49 = vpack.c.bf16 %v2080_v60, %v2078_v57  ;;  %v2062_v33 = vcvt.s32.f32 %v3017_v0  ;;  %v2214_v23 = vcvt.s32.f32 %v3028_v3 }
 0x194   : > { %v2278_v57 = vshra.s32 %v4381_v14, 12  ;;  %v2205_v2 = vand.u32 15, %v2201_v53  ;;  %v2426_v0 = vshra.s32 %v4381_v14, 20 }
 0x195   : > { %3243 = vmatmul.mubr.msk.bf16.vlgmr.msra.gmra.mrb[4].mxu1 %vm1036_vm1, %v4266_v63  ;;  %v2083_v63 = vshra.s32 %v4386_v9, 4  ;;  %2112 = vmatprep.subr.bf16.mxu0 %v2104_v30  ;;  %v2077_v60 = vmul.f32 %v4396_v46, %v2062_v33 }
 0x197   : > { %v2087_v47 = vand.u32 15, %v2083_v63 }
 0x199   : > { %v3021_v50 = vadd.s32 4294967288, %v2087_v47  ;;  %v2208_v47 = vand.u32 15, %v2204_v25  ;;  %v2349_v25 = vshra.s32 %v4386_v9, 16 }
 0x19b   : > { %v2095_v31 = vcvt.s32.f32 %v3021_v50  ;;  %v3030_v38 = vadd.s32 4294967288, %v2208_v47  ;;  %v2064_v50 = vcvt.s32.f32 %v3019_v52  ;;  %v2424_v47 = vshra.s32 %v4378_v51, 20 }
 0x19c   : > { %v2353_v3 = vand.u32 15, %v2349_v25  ;;  %v3055_v25 = vshrl.u32 %v4381_v14, 28 }
 0x19d   : > { %v2099_v5 = vmul.f32 %v2095_v31, %v4396_v46  ;;  %v2216_v31 = vcvt.s32.f32 %v3030_v38  ;;  %v2079_v1 = vmul.f32 %v4396_v46, %v2064_v50  ;;  %v2355_v38 = vand.u32 15, %v2351_v58 }
 0x19e   : > { %v2428_v53 = vand.u32 15, %v2424_v47 }
 0x19f   : > { %v2103_v12 = vpack.c.bf16 %v2101_v45, %v2099_v5  ;;  %v2207_v5 = vand.u32 15, %v2203_v22  ;;  %v2218_v45 = vmul.f32 %v2214_v23, %v4398_v48  ;;  %v2220_v30 = vmul.f32 %v2216_v31, %v4398_v48 }
 0x1a0   : > { %v2430_v22 = vand.u32 15, %v2426_v0  ;;  %v3037_v31 = vadd.s32 4294967288, %v2353_v3 }
 0x1a1   : > { %2113 = vmatpush1.bf16.msra.mxu0 %v2103_v12  ;;  %v2282_v12 = vand.u32 15, %v2278_v57 }
 0x1a2   : > { %2158 = vmatprep.subr.bf16.mxu0 %v2082_v49  ;;  %v2280_v49 = vand.u32 15, %v2276_v56  ;;  %v3039_v56 = vadd.s32 4294967288, %v2355_v38 }
 0x214   : > { %v1966_v54 = vpop.f32.mrb[0].mxu0 }
 0x215   : > { %v3236_v15 = vpop.f32.mrb[1].mxu0 }
 0x216   : > { %v1969_v17 = vpop.f32.mrb[2].mxu0  ;;  %v3027_v15 = vadd.s32 4294967288, %v2205_v2 }
 0x217   : > { %v3237_v26 = vpop.f32.mrb[3].mxu0 }
 0x218   : > { %v2222_v26 = vpack.c.bf16 %v2220_v30, %v2218_v45  ;;  %v2363_v45 = vcvt.s32.f32 %v3039_v56  ;;  %v2423_v30 = vshra.s32 %v4386_v9, 20 }
 0x230   : > { %v1425_v10 = vpop.f32.mrb[0].mxu1 }
 0x231   : > { %v3246_v7 = vadd.f32 %v1966_v54, %v1425_v10  ;;  %v3172_v11 = vpop.f32.mrb[1].mxu1  ;;  %v2081_v54 = vpack.c.bf16 %v2079_v1, %v2077_v60  ;;  %v3033_v10 = vadd.s32 4294967288, %v2280_v49  ;;  %v3043_v60 = vadd.s32 4294967288, %v2428_v53 }
 0x232   : > { %v1428_v13 = vpop.f32.mrb[2].mxu1  ;;  %v3045_v1 = vadd.s32 4294967288, %v2430_v22  ;;  %v2425_v49 = vshra.s32 %v4389_v19, 20  ;;  %v3052_v53 = vshrl.u32 %v4386_v9, 28  ;;  %v3054_v22 = vshrl.u32 %v4389_v19, 28 }
 0x233   : > { %v3247_v43 = vadd.f32 %v1969_v17, %v1428_v13  ;;  %v3173_v32 = vpop.f32.mrb[3].mxu1  ;;  %v3015_v34 = vmul.f32 -1.442695, %v3246_v7  ;;  %v3029_v17 = vadd.s32 4294967288, %v2207_v5  ;;  %v2213_v13 = vcvt.s32.f32 %v3027_v15 }
 0x234   : > { %v2275_v32 = vshra.s32 %v4386_v9, 12  ;;  %v2361_v5 = vcvt.s32.f32 %v3037_v31  ;;  %v2498_v15 = vshra.s32 %v4378_v51, 24 }
 0x235   : > { %v3016_v44 = vmul.f32 -1.442695, %v3247_v43  ;;  %3474 = vpow2.f32 %v3015_v34  ;;  %v2277_v34 = vshra.s32 %v4389_v19, 12 }
 0x237   : > { %3476 = vpow2.f32 %v3016_v44  ;;  %v2288_v44 = vcvt.s32.f32 %v3033_v10  ;;  %v2367_v10 = vmul.f32 %v2363_v45, %v4396_v46 }
 0x23f   : > { %v3475_v59 = vpop.eup %3474 }
 0x240   : > { %v2024_v42 = vadd.f32 1.0, %v3475_v59 }
 0x241   : > { %v3477_v39 = vpop.eup %3476 }
 0x242   : > { %v2025_v24 = vadd.f32 1.0, %v3477_v39  ;;  %3478 = vrcp.f32 %v2024_v42  ;;  %v2350_v39 = vshra.s32 %v4378_v51, 16  ;;  %v2352_v42 = vshra.s32 %v4381_v14, 16 }
 0x244   : > { %3480 = vrcp.f32 %v2025_v24  ;;  %v2217_v24 = vmul.f32 %v2213_v13, %v4396_v46 }
 0x24c   : > { %v3479_v8 = vpop.eup %3478 }
 0x24d   : > { %v2030_v28 = vmul.f32 %v3479_v8, %v3246_v7  ;;  %v3035_v7 = vadd.s32 4294967288, %v2282_v12  ;;  %v2436_v12 = vcvt.s32.f32 %v3043_v60  ;;  %v3058_v60 = vadd.s32 4294967288, %v3054_v22 }
 0x24e   : > { %v3481_v27 = vpop.eup %3480 }
 0x24f   : > { %v2031_v18 = vmul.f32 %v3481_v27, %v3247_v43  ;;  %v2215_v43 = vcvt.s32.f32 %v3029_v17  ;;  %v2290_v59 = vcvt.s32.f32 %v3035_v7  ;;  %v2279_v27 = vand.u32 15, %v2275_v32 }
 0x250   : > { %v2500_v17 = vshra.s32 %v4381_v14, 24  ;;  %v2427_v7 = vand.u32 15, %v2423_v30  ;;  %v2440_v13 = vmul.f32 %v2436_v12, %v4398_v48  ;;  %v2502_v32 = vand.u32 15, %v2498_v15  ;;  %v2645_v12 = vld [vmem:[#allocation2] sm:$0xff] }
 0x251   : > { %v2219_v8 = vmul.f32 %v2215_v43, %v4396_v46  ;;  %v2585_v45 = vcvt.s32.f32 %v3058_v60 }
 0x268   : > { %v2009_v62 = vpop.f32.mrb[4].mxu1 }
 0x269   : > { %v2032_v4 = vmul.f32 %v2030_v28, %v2009_v62  ;;  %v3244_v6 = vpop.f32.mrb[5].mxu1  ;;  %v2281_v28 = vand.u32 15, %v2277_v34  ;;  %v2292_v62 = vmul.f32 %v2288_v44, %v4398_v48  ;;  %v2504_v34 = vand.u32 15, %v2500_v17  ;;  %v2647_v17 = vld [vmem:[#allocation2 + $0x10] sm:$0xff] }
 0x26a   : > { %v2012_v29 = vpop.f32.mrb[6].mxu1  ;;  %v2354_v6 = vand.u32 15, %v2350_v39 }
 0x26b   : > { %v2033_v35 = vmul.f32 %v2031_v18, %v2012_v29  ;;  %v3245_v63 = vpop.f32.mrb[7].mxu1  ;;  %v2046_v36 = vmul.f32 %v2039_v55, %v2032_v4  ;;  %v2294_v4 = vmul.f32 %v2290_v59, %v4398_v48  ;;  %v2356_v18 = vand.u32 15, %v2352_v42 }
 0x26c   : > { %v2221_v55 = vpack.c.bf16 %v2219_v8, %v2217_v24  ;;  %v3032_v29 = vadd.s32 4294967288, %v2279_v27  ;;  %v3038_v63 = vadd.s32 4294967288, %v2354_v6  ;;  %v3042_v59 = vadd.s32 4294967288, %v2427_v7  ;;  %v2648_v7 = vld [vmem:[#allocation2 + $0x18] sm:$0xff] }
 0x26d   : > { %v2047_v41 = vmul.f32 %v2044_v16, %v2033_v35  ;;  %v3034_v16 = vadd.s32 4294967288, %v2281_v28  ;;  %v2296_v35 = vpack.c.bf16 %v2294_v4, %v2292_v62  ;;  %v3048_v24 = vadd.s32 4294967288, %v2502_v32 }
 0x26e   : > { %v2362_v61 = vcvt.s32.f32 %v3038_v63  ;;  %v3050_v8 = vadd.s32 4294967288, %v2504_v34  ;;  %v2435_v28 = vcvt.s32.f32 %v3042_v59  ;;  %v2497_v4 = vshra.s32 %v4386_v9, 24 }
 0x26f   : > { %v4406_v20 = vpack.c.bf16 %v2047_v41, %v2046_v36  ;;  %v3040_v36 = vadd.s32 4294967288, %v2356_v18  ;;  %v2287_v41 = vcvt.s32.f32 %v3032_v29  ;;  %v2289_v21 = vcvt.s32.f32 %v3034_v16 }
 0x270   : > { %v2366_v33 = vmul.f32 %v2362_v61, %v4398_v48  ;;  %v2499_v6 = vshra.s32 %v4389_v19, 24  ;;  %v2510_v18 = vcvt.s32.f32 %v3048_v24  ;;  %v2439_v29 = vmul.f32 %v2435_v28, %v4396_v46 }
 0x271   : > { %2223 = vrot.lane.b32.xlu0 %v4406_v20, %s3668_s3  ;;  %2106 = vrot.lane.b32.xlu1 %v4406_v20, %s3674_s19  ;;  %v2364_v40 = vcvt.s32.f32 %v3040_v36  ;;  %v2291_v52 = vmul.f32 %v2287_v41, %v4396_v46  ;;  %v2589_v19 = vmul.f32 %v2585_v45, %v4396_v46 }
 0x272   : > { %v2503_v63 = vand.u32 15, %v2499_v6  ;;  %v2514_v36 = vmul.f32 %v2510_v18, %v4398_v48 }
 0x273   : > { %v2368_v50 = vmul.f32 %v2364_v40, %v4398_v48 }
 0x274   : > { %v3049_v40 = vadd.s32 4294967288, %v2503_v63 }
 0x275   : > { %2371 = vrot.lane.b32.xlu0 %v4406_v20, %s3672_s30  ;;  %2297 = vrot.lane.b32.xlu1 %v4406_v20, %s3675_s27  ;;  %v2370_v57 = vpack.c.bf16 %v2368_v50, %v2366_v33 }
 0x276   : > { %v2511_v38 = vcvt.s32.f32 %v3049_v40 }
 0x278   : > { %v2515_v14 = vmul.f32 %v2511_v38, %v4396_v46 }
 0x279   : > { %2519 = vrot.lane.b32.xlu0 %v4406_v20, %s3669_s8  ;;  %2445 = vrot.lane.b32.xlu1 %v4406_v20, %s3676_s29 }
 0x27d   : > { %2593 = vrot.lane.b32.xlu1 %v4406_v20, %s3677_s2 }
 0x2e3   : > { %v2107_v11 = vpop.permute.xlu1 %2106  ;;  %v2224_v2 = vpop.permute.xlu0 %2223 }
 0x2e4   : > { %3025 = vmatmul.mubr.msk.bf16.vlgmr.msra.gmra.mrb[4].mxu0 %vm2108_vm2, %v2107_v11  ;;  %v2429_v11 = vand.u32 15, %v2425_v49 }
 0x2e5   : > { %2159 = vmatpush1.bf16.msra.mxu0 %v2081_v54  ;;  %2190 = vmatprep.mubr.bf16.mxu0 %v3673_v37  ;;  %v2438_v54 = vcvt.s32.f32 %v3045_v1 }
 0x2e6   : > { %2228 = vmatprep.subr.bf16.mxu0 %v2222_v26  ;;  %v2365_v26 = vmul.f32 %v2361_v5, %v4396_v46  ;;  %v3044_v39 = vadd.s32 4294967288, %v2429_v11 }
 0x2e7   : > { %v2442_v43 = vmul.f32 %v2438_v54, %v4398_v48  ;;  %v2298_v27 = vpop.permute.xlu1 %2297  ;;  %v2646_v54 = vld [vmem:[#allocation2 + $0x8] sm:$0xff] }
 0x2e8   : > { %v2369_v44 = vpack.c.bf16 %v2367_v10, %v2365_v26  ;;  %v2437_v62 = vcvt.s32.f32 %v3044_v39 }
 0x2e9   : > { %v2444_v42 = vpack.c.bf16 %v2442_v43, %v2440_v13 }
 0x2ea   : > { %v2441_v16 = vmul.f32 %v2437_v62, %v4396_v46 }
 0x2ec   : > { %v2443_v58 = vpack.c.bf16 %v2441_v16, %v2439_v29 }
 0x2f0   : > { %3026 = vmatmul.mubr.msk.bf16.vlgmr.msra.gmra.mrb[4].mxu0 %vm2108_vm2, %v4406_v20  ;;  %v2293_v20 = vmul.f32 %v2289_v21, %v4396_v46  ;;  %v3053_v21 = vshrl.u32 %v4378_v51, 28 }
 0x2f1   : > { %2229 = vmatpush1.bf16.msra.mxu0 %v2221_v55  ;;  %2260 = vmatprep.mubr.bf16.mxu0 %v3673_v37  ;;  %v2512_v55 = vcvt.s32.f32 %v3050_v8 }
 0x2f2   : > { %2302 = vmatprep.subr.bf16.mxu0 %v2296_v35  ;;  %v2295_v23 = vpack.c.bf16 %v2293_v20, %v2291_v52  ;;  %v2501_v35 = vand.u32 15, %v2497_v4  ;;  %v3057_v0 = vadd.s32 4294967288, %v3053_v21  ;;  %v3059_v52 = vadd.s32 4294967288, %v3055_v25  ;;  %v2372_v20 = vpop.permute.xlu0 %2371 }
 0x2f3   : > { %v2516_v41 = vmul.f32 %v2512_v55, %v4398_v48 }
 0x2f4   : > { %v3047_v61 = vadd.s32 4294967288, %v2501_v35  ;;  %v2584_v33 = vcvt.s32.f32 %v3057_v0  ;;  %v2586_v50 = vcvt.s32.f32 %v3059_v52 }
 0x2f5   : > { %v2518_v47 = vpack.c.bf16 %v2516_v41, %v2514_v36 }
 0x2f6   : > { %v2509_v3 = vcvt.s32.f32 %v3047_v61  ;;  %v2590_v31 = vmul.f32 %v2586_v50, %v4398_v48  ;;  %v2520_v49 = vpop.permute.xlu0 %2519 }
 0x2f8   : > { %v2513_v51 = vmul.f32 %v2509_v3, %v4396_v46 }
 0x2fa   : > { %v2517_v56 = vpack.c.bf16 %v2515_v14, %v2513_v51 }
 0x2fc   : > { %3031 = vmatmul.mubr.msk.bf16.vlgmr.msra.gmra.mrb[4].mxu0 %vm2108_vm2, %v2224_v2  ;;  %v2446_v2 = vpop.permute.xlu1 %2445 }
 0x2fd   : > { %2303 = vmatpush1.bf16.msra.mxu0 %v2295_v23  ;;  %2334 = vmatprep.mubr.bf16.mxu0 %v3673_v37  ;;  %v2588_v23 = vmul.f32 %v2584_v33, %v4398_v48 }
 0x2fe   : > { %2376 = vmatprep.subr.bf16.mxu0 %v2370_v57  ;;  %v3056_v57 = vadd.s32 4294967288, %v3052_v53 }
 0x2ff   : > { %v2592_v1 = vpack.c.bf16 %v2590_v31, %v2588_v23 }
 0x300   : > { %v2583_v5 = vcvt.s32.f32 %v3056_v57  ;;  %v2594_v48 = vpop.permute.xlu1 %2593 }
 0x302   : > { %v2587_v9 = vmul.f32 %v2583_v5, %v4396_v46 }
 0x304   : > { %v2591_v30 = vpack.c.bf16 %v2589_v19, %v2587_v9 }
 0x308   : > { %3036 = vmatmul.mubr.msk.bf16.vlgmr.msra.gmra.mrb[4].mxu0 %vm2108_vm2, %v2298_v27 }
 0x309   : > { %2377 = vmatpush1.bf16.msra.mxu0 %v2369_v44  ;;  %2408 = vmatprep.mubr.bf16.mxu0 %v3673_v37 }
 0x30a   : > { %2450 = vmatprep.subr.bf16.mxu0 %v2444_v42 }
 0x314   : > { %3041 = vmatmul.mubr.msk.bf16.vlgmr.msra.gmra.mrb[4].mxu0 %vm2108_vm2, %v2372_v20 }
 0x315   : > { %2451 = vmatpush1.bf16.msra.mxu0 %v2443_v58  ;;  %2482 = vmatprep.mubr.bf16.mxu0 %v3673_v37 }
 0x316   : > { %2524 = vmatprep.subr.bf16.mxu0 %v2518_v47 }
 0x320   : > { %3046 = vmatmul.mubr.msk.bf16.vlgmr.msra.gmra.mrb[4].mxu0 %vm2108_vm2, %v2446_v2 }
 0x321   : > { %2525 = vmatpush1.bf16.msra.mxu0 %v2517_v56  ;;  %2556 = vmatprep.mubr.bf16.mxu0 %v3673_v37 }
 0x322   : > { %2598 = vmatprep.subr.bf16.mxu0 %v2592_v1 }
 0x32c   : > { %3051 = vmatmul.mubr.msk.bf16.vlgmr.msra.gmra.mrb[4].mxu0 %vm2108_vm2, %v2520_v49 }
 0x32d   : > { %2599 = vmatpush1.bf16.msra.mxu0 %v2591_v30  ;;  %2630 = vmatprep.mubr.bf16.mxu0 %v3673_v37 }
 0x338   : > { %3060 = vmatmul.mubr.msk.bf16.vlgmr.msra.gmra.mrb[4].mxu0 %vm2108_vm2, %v2594_v48 }
 0x40b   : > { %v2632_v15 = vpop.f32.mrb[4].mxu0 }
 0x40c   : > { %v2649_v26 = vadd.f32 %v2645_v12, %v2632_v15  ;;  %v2634_v10 = vpop.f32.mrb[5].mxu0 }
 0x40d   : > { %v2650_v11 = vadd.f32 %v2646_v54, %v2634_v10  ;;  %v2636_v13 = vpop.f32.mrb[6].mxu0 }
 0x40e   : > { %2653 = vst [vmem:[#allocation2] sm:$0xff] %v2649_v26  ;;  %v2651_v46 = vadd.f32 %v2647_v17, %v2636_v13  ;;  %v2638_v43 = vpop.f32.mrb[7].mxu0 }
 0x40f   : > { %2654 = vst [vmem:[#allocation2 + $0x8] sm:$0xff] %v2650_v11  ;;  %v2652_v32 = vadd.f32 %v2648_v7, %v2638_v43 }
 0x410   : > { %2655 = vst [vmem:[#allocation2 + $0x10] sm:$0xff] %v2651_v46 }
 0x411   : > { %2656 = vst [vmem:[#allocation2 + $0x18] sm:$0xff] %v2652_v32 }
 0x412 PF: > { %s4659_s13 = sld [smem:[#allocation19_spill]]  ;;  %s4660_s17 = sld [smem:[#allocation18_spill]] }
 0x418   : > { %p2657_p9 = scmp.eq.s32.totalorder %s4659_s13, 7  ;;  %p2658_p10 = scmp.eq.s32.totalorder %s4660_s17, 2 }
 0x41a   : > { %p2659_p11 = pnand %p2658_p10, %p2657_p9 }
 0x41b   : > { %v2663_v37 = vld [vmem:[#allocation2] sm:$0xff] (!%p2659_p11)  ;;  %v2664_v34 = vld [vmem:[#allocation2 + $0x8] sm:$0xff] (!%p2659_p11)  ;;  %v2665_v44 = vld [vmem:[#allocation2 + $0x10] sm:$0xff] (!%p2659_p11) }
 0x41c   : > { %2662 = sbr.rel (%p2659_p11) target bundleno = 1059 (0x423), region = 140  ;;  %2667 = vst [vmem:[%s3993_s1] sm:$0xff] (!%p2659_p11), %v2663_v37  ;;  %2668 = vst [vmem:[%s3993_s1 + $0x8] sm:$0xff] (!%p2659_p11), %v2664_v34  ;;  %v2666_v59 = vld [vmem:[#allocation2 + $0x18] sm:$0xff] (!%p2659_p11) }
 0x41d   : > { %2669 = vst [vmem:[%s3993_s1 + $0x10] sm:$0xff] (!%p2659_p11), %v2665_v44  ;;  %2670 = vst [vmem:[%s3993_s1 + $0x18] sm:$0xff] (!%p2659_p11), %v2666_v59 }
 0x423 PF: > { %s4661_s15 = sld [smem:[#allocation20_spill]]  ;;  %s4662_s14 = sld [smem:[#allocation39_spill]] }
 0x424   : > { %s2686_s21 = sshll.u32 %s3993_s1, 4  ;;  %s4664_s5 = sand.u32 1, %s3614_s12   ;;  %s4499_s21 = int_to_ptr.vmem [resolvable:$true] %s2686_s21 }
 0x425   : > { %s4503_s20 = scalar_lea.sflag [#allocation10], %s4664_s5  ;;  %s3518_s3 = scalar_lea.vmem %s4499_s21, 512 }
 0x426   : > { %p3519_p12 = scmp.ne.s32.totalorder %s4499_s21, %s3518_s3  ;;  %s3678_s8 = smov [#allocation9]  }
 0x427   : > { %s3522_s30 = sshll.u32 %s3678_s8, 4  ;;  %s3523_s30 = int_to_ptr.vmem [resolvable:$false] %s3522_s30 }
 0x428   : > { %p3520_p13 = pnand %p3519_p12, %p3881_p1  ;;  %s3524_s0 = scalar_lea.vmem %s3523_s30, 1024 }
 0x429   : > { %s3069_s7 = sshll.u32 %s4661_s15, 9  ;;  %s4663_s4 = smov %s4662_s14 }
 0x42a   : > { %s4496_s16 = scalar_lea.hbm %s4662_s14, %s3069_s7  ;;  %p3521_p0 = pneg %p3520_p13 }
 0x42b   : > { %p3525_p2 = scmp.lt.s32.totalorder %s4499_s21, %s3523_s30  ;;  %p3526_p4 = scmp.lt.s32.totalorder %s3524_s0, %s3518_s3 }
 0x42d   : > { %p3527_p5 = por %p3526_p4, %p3525_p2 }
 0x42f   : > { %p3528_p6 = pnand %p3527_p5, %p3521_p0 }
 0x431   : > { %3531 = shalt.err (!%p3528_p6)
}
 0x432   : > { %s3532_s1 = scalar_lea.hbm %s4496_s16, 512  ;;  %s3536_s24 = scalar_lea.hbm %s4663_s4, 1536 }
 0x433   : > { %p3533_p7 = scmp.ne.s32.totalorder %s4496_s16, %s3532_s1  ;;  %p3537_p10 = scmp.lt.u32.totalorder %s4496_s16, %s4663_s4 }
 0x434   : > { %p3538_p11 = scmp.lt.u32.totalorder %s3536_s24, %s3532_s1  ;;  %p3540_p13 = scmp.lt.u32.totalorder %s3532_s1, %s4496_s16 }
 0x435   : > { %p3534_p8 = pnand %p3533_p7, %p3881_p1 }
 0x436   : > { %p3539_p12 = por %p3538_p11, %p3537_p10 }
 0x437   : > { %p3535_p9 = pneg %p3534_p8 }
 0x438   : > { %p3541_p0 = por %p3540_p13, %p3539_p12 }
 0x43a   : > { %p3542_p2 = pnand %p3541_p0, %p3535_p9 }
 0x43c   : > { %3545 = shalt.err (!%p3542_p2)
}
 0x43d   : > { %s3679_s6 = smov 256   ;;  %s3680_s22 = smov 16  }
 0x43e   : > { %3334 = dma.vmem_to_hbm [thread:$0]  (%p3881_p1), %s4499_s21, 512, %s4496_s16, %s4503_s20, %s3679_s6, %s3679_s6, %s3680_s22  }
 0x43f PF: > { %s4665_s19 = sld [smem:[#allocation13_spill]]  ;;  %p3340_p4 = scmp.ge.s32.totalorder %s3662_s23, 2 }
 0x441   : > { %p3337_p5 = pnand %p3340_p4, %p3895_p3 }
 0x445   : > { %s2701_s29 = sand.u32 1, %s4665_s19  }
 0x446   : > { %s2702_s2 = scalar_lea.sflag [#allocation10], %s2701_s29 }
 0x447   : > { %3605 = dma.done.wait (!%p3337_p5), %s2702_s2, 512  }
 0x448   : > { %3607 = vsyncadd (!%p3337_p5), %s2702_s2, 4294966784  ;;  %s38_s23 = sadd.s32 1, %s3662_s23   ;;  %s4668_s25 = sld [smem:[#allocation14_spill]] }
 0x449   : > { %p4532_p6 = scmp.ge.s32.totalorder %s38_s23, 74   ;;  %s4669_s2 = sld [smem:[#allocation28_spill]] }
 0x44a   : > { %s4670_s17 = sld [smem:[#allocation16_spill]]  ;;  %s4671_s14 = sld [smem:[#allocation29_spill]] }
 0x44b   : > { %s4672_s15 = sld [smem:[#allocation17_spill]]  ;;  %s4673_s16 = sld [smem:[#allocation27_spill]] }
 0x44c   : > { %s4674_s7 = sld [smem:[#allocation21_spill]]  ;;  %s4675_s18 = sld [smem:[#allocation22_spill]] }
 0x44d   : > { %s4676_s19 = sld [smem:[#allocation23_spill]]  ;;  %s4677_s20 = sld [smem:[#allocation24_spill]] }
 0x44e   : > { %s4678_s21 = sld [smem:[#allocation25_spill]]  ;;  %s4679_s22 = sld [smem:[#allocation26_spill]] }
 0x44f   : > { %s4681_s30 = smov %s3614_s12  ;;  %s4682_s12 = smov %s4668_s25 }
 0x450   : > { %s4683_s13 = smov %s4670_s17  ;;  %37 = sbr.rel (!%p4532_p6) target bundleno = 46 (0x2e), region = 206 }
 0x452   : > { %s4684_s17 = smov %s4674_s7 }
 0x457   :  { %2707 = vsyncpa [#allocation10], 1 }
 0x458   :  { %2709 = vsyncpa [#allocation10 + $0x1], 1 }

</bundles_post_ra>
